<compile_context>
chip_gen: v7x
topology: tpu7x:2x2x1
jax: 0.10.0
libtpu: 0.0.40
codegen_flags: <defaults>
</compile_context>

<pallas_src>
import math

import jax
import jax.numpy as jnp
from jax.experimental import pallas as pl
from jax.experimental.pallas import tpu as pltpu

LANE = 128


def _round_up(x, m):
    return (x + m - 1) // m * m


def _pick_q_tile(seq_len):
    # Big query tiles amortize the ~0.35 us per-grid-step overhead; fall back to the
    # full (small) sequence when it is not a multiple of a tile size.
    for t in (512, 256, 128):
        if seq_len % t == 0:
            return t
    return seq_len


def _vmem_limit_bytes():
    # Per-generation VMEM budget: ~3/4 of physical (96 MiB on v5e/v6e's 128 MiB,
    # 48 MiB on v7x's 64 MiB). Conservative 48 MiB fallback is safe everywhere.
    try:
        cap = int(pltpu.get_tpu_info().vmem_capacity_bytes)
    except Exception:
        cap = 64 * 1024 * 1024
    return max(32 * 1024 * 1024, min((cap * 3) // 4, 100 * 1024 * 1024))


def _mha_kernel_factory(seq_len, num_heads, hd_pad, q_tile, scale):
    def kernel(q_ref, k_ref, v_ref, bias_ref,
               wq_ref, bq_ref, wk_ref, bk_ref, wv_ref, bv_ref, wo_ref, bo_ref,
               o_ref, k_scr, v_scr):
        S, NH, tq = seq_len, num_heads, q_tile
        Dh = NH * hd_pad

        # ---- K/V projection: once per batch element, reused by every query tile ----
        @pl.when(pl.program_id(1) == 0)
        def _():
            k = jnp.dot(k_ref[0], wk_ref[...],
                        preferred_element_type=jnp.float32) + bk_ref[...]
            v = jnp.dot(v_ref[0], wv_ref[...],
                        preferred_element_type=jnp.float32) + bv_ref[...]
            # [S, NH*hd_pad] -> head-major [NH, S, hd_pad]; hd_pad is a lane multiple,
            # so the relayout never crosses a (8,128) tile boundary.
            k_scr[...] = k.reshape(S, NH, hd_pad).transpose(1, 0, 2).astype(jnp.bfloat16)
            v_scr[...] = v.reshape(S, NH, hd_pad).transpose(1, 0, 2).astype(jnp.bfloat16)

        # ---- Q projection for this query tile (1/sqrt(head_dim) folded in once) ----
        q = jnp.dot(q_ref[0], wq_ref[...],
                    preferred_element_type=jnp.float32) + bq_ref[...]
        q = (q * scale).astype(jnp.bfloat16)
        q_h = q.reshape(tq, NH, hd_pad).transpose(1, 0, 2)          # [NH, tq, hd_pad]

        # ---- attention: softmax over the full key axis, kept in f32 ----
        scores = jnp.einsum("hqd,hkd->hqk", q_h, k_scr[...],
                            preferred_element_type=jnp.float32)     # [NH, tq, S]
        scores = scores + bias_ref[0][None, :, :]                   # structure bias

        m = jnp.max(scores, axis=-1, keepdims=True)
        e = jnp.exp(scores - m)
        denom = jnp.sum(e, axis=-1, keepdims=True)
        # approx reciprocal -> EUP slot; row-sum error ~1e-3, below bf16 rounding of attn.
        attn = (e * pl.reciprocal(denom, approx=True)).astype(jnp.bfloat16)

        # Dropout(p=0.1) is identity in eval mode.
        ctx = jnp.einsum("hqk,hkd->hqd", attn, v_scr[...],
                         preferred_element_type=jnp.float32)        # [NH, tq, hd_pad]

        # ---- output projection; lane-dense [tq, Hp] store ----
        ctx2 = ctx.transpose(1, 0, 2).reshape(tq, Dh).astype(jnp.bfloat16)
        out = jnp.dot(ctx2, wo_ref[...],
                      preferred_element_type=jnp.float32) + bo_ref[...]
        o_ref[0] = out.astype(o_ref.dtype)

    return kernel


def multi_head_attention(query, key, value, structure_bias, params, num_heads):
    """query/key/value: [B, S, H]; structure_bias: [B, S, S] (or None). Eval-mode forward."""
    B, S, H = query.shape
    assert H % num_heads == 0, "hidden_dim must be divisible by num_heads"
    hd = H // num_heads
    hd_pad = _round_up(hd, LANE)          # lane-dense per-head slab (MXU fill)
    Hp = _round_up(H, LANE)               # lane-dense activations / output store
    Dh = num_heads * hd_pad
    tq = _pick_q_tile(S)
    scale = 1.0 / math.sqrt(hd)

    if structure_bias is None:
        structure_bias = jnp.zeros((B, S, S), jnp.float32)

    # --- activations: pad hidden dim to lanes, cast to bf16 at the call boundary ---
    def prep_x(x):
        return jnp.pad(x, ((0, 0), (0, 0), (0, Hp - H))).astype(jnp.bfloat16)

    q_in, k_in, v_in = prep_x(query), prep_x(key), prep_x(value)

    # --- weights: per-head split + zero padding keeps the math exact ---
    def prep_qkv_w(w_t):                  # [H, H] -> [Hp, NH*hd_pad] bf16
        w = w_t.reshape(H, num_heads, hd)
        w = jnp.pad(w, ((0, Hp - H), (0, 0), (0, hd_pad - hd)))
        return w.reshape(Hp, Dh).astype(jnp.bfloat16)

    def prep_qkv_b(b):                    # [1, H] -> [1, NH*hd_pad] f32
        b = b.reshape(num_heads, hd)
        b = jnp.pad(b, ((0, 0), (0, hd_pad - hd)))
        return b.reshape(1, Dh)

    wo = params["wo_t"].reshape(num_heads, hd, H)
    wo = jnp.pad(wo, ((0, 0), (0, hd_pad - hd), (0, Hp - H)))
    wo = wo.reshape(Dh, Hp).astype(jnp.bfloat16)
    bo = jnp.pad(params["bo"], ((0, 0), (0, Hp - H)))

    kernel = _mha_kernel_factory(S, num_heads, hd_pad, tq, scale)

    def act_q_map(b, qt):
        return (b, qt, 0)

    def act_kv_map(b, qt):
        return (b, 0, 0)

    def const_spec(shape):
        # Constant block index => fetched once; single-buffer to reclaim VMEM.
        try:
            return pl.BlockSpec(shape, lambda b, qt: (0, 0),
                                pipeline_mode=pl.Buffered(1))
        except (AttributeError, TypeError):
            # TODO(synk): older jax without BlockSpec.pipeline_mode -> default 2-buffering.
            return pl.BlockSpec(shape, lambda b, qt: (0, 0))

    flops = 8 * B * S * Hp * Dh + 4 * B * num_heads * S * S * hd_pad
    bytes_accessed = (3 * B * S * Hp * 2 + B * S * S * 4
                      + 4 * Hp * Dh * 2 + (3 * Dh + Hp) * 4
                      + B * S * Hp * query.dtype.itemsize)
    cost = pl.CostEstimate(flops=flops,
                           transcendentals=B * num_heads * S * S,
                           bytes_accessed=bytes_accessed)

    out = pl.pallas_call(
        kernel,
        out_shape=jax.ShapeDtypeStruct((B, S, Hp), query.dtype),
        grid_spec=pltpu.PrefetchScalarGridSpec(
            num_scalar_prefetch=0,
            grid=(B, S // tq),
            in_specs=[
                pl.BlockSpec((1, tq, Hp), act_q_map),    # query tile   (bf16)
                pl.BlockSpec((1, S, Hp), act_kv_map),    # key          (bf16, once/batch)
                pl.BlockSpec((1, S, Hp), act_kv_map),    # value        (bf16, once/batch)
                pl.BlockSpec((1, tq, S), act_q_map),     # structure_bias tile (f32)
                const_spec((Hp, Dh)),                    # Wq^T (bf16, per-head padded)
                const_spec((1, Dh)),                     # bq   (f32)
                const_spec((Hp, Dh)),                    # Wk^T
                const_spec((1, Dh)),                     # bk
                const_spec((Hp, Dh)),                    # Wv^T
                const_spec((1, Dh)),                     # bv
                const_spec((Dh, Hp)),                    # Wo^T
                const_spec((1, Hp)),                     # bo
            ],
            out_specs=pl.BlockSpec((1, tq, Hp), act_q_map),
            scratch_shapes=[
                pltpu.VMEM((num_heads, S, hd_pad), jnp.bfloat16),   # K, head-major
                pltpu.VMEM((num_heads, S, hd_pad), jnp.bfloat16),   # V, head-major
            ],
        ),
        # Query-tile axis is "arbitrary" so the qt==0 K/V projection is reused by later
        # tiles. TODO(synk): on v7x small-batch inference, mark it "parallel" (and
        # recompute K/V per tile) to occupy both TensorCores.
        compiler_params=pltpu.CompilerParams(
            dimension_semantics=("parallel", "arbitrary"),
            vmem_limit_bytes=_vmem_limit_bytes()),
        cost_estimate=cost,
    )(q_in, k_in, v_in, structure_bias,
      prep_qkv_w(params["wq_t"]), prep_qkv_b(params["bq"]),
      prep_qkv_w(params["wk_t"]), prep_qkv_b(params["bk"]),
      prep_qkv_w(params["wv_t"]), prep_qkv_b(params["bv"]),
      wo, bo)

    return out[..., :H] if Hp != H else out


def reference_mha(query, key, value, structure_bias, params, num_heads):
    """Pure-JAX f32 reference mirroring the PyTorch forward (eval mode)."""
    B, S, H = query.shape
    hd = H // num_heads
    q = query @ params["wq_t"] + params["bq"]
    k = key @ params["wk_t"] + params["bk"]
    v = value @ params["wv_t"] + params["bv"]
    q = q.reshape(B, S, num_heads, hd).transpose(0, 2, 1, 3)
    k = k.reshape(B, S, num_heads, hd).transpose(0, 2, 1, 3)
    v = v.reshape(B, S, num_heads, hd).transpose(0, 2, 1, 3)
    scores = jnp.einsum("bhqd,bhkd->bhqk", q, k) / math.sqrt(hd)
    scores = scores + structure_bias[:, None, :, :]
    attn = jax.nn.softmax(scores, axis=-1)
    out = jnp.einsum("bhqk,bhkd->bhqd", attn, v)
    out = out.transpose(0, 2, 1, 3).reshape(B, S, H)
    return out @ params["wo_t"] + params["bo"]


def init_params(key, hidden_dim):
    """Deterministic synthetic init (PyTorch Linear-style bound)."""
    ks = jax.random.split(key, 8)
    bound = 1.0 / math.sqrt(hidden_dim)
    u = lambda k, shape: jax.random.uniform(k, shape, jnp.float32, -bound, bound)
    return {
        # Stored pre-transposed: [in, out]
        "wq_t": u(ks[0], (hidden_dim, hidden_dim)),
        "bq":   u(ks[1], (1, hidden_dim)),
        "wk_t": u(ks[2], (hidden_dim, hidden_dim)),
        "bk":   u(ks[3], (1, hidden_dim)),
        "wv_t": u(ks[4], (hidden_dim, hidden_dim)),
        "bv":   u(ks[5], (1, hidden_dim)),
        "wo_t": u(ks[6], (hidden_dim, hidden_dim)),
        "bo":   u(ks[7], (1, hidden_dim)),
    }


if __name__ == "__main__":
    B, S, H, NH = 2, 8, 32, 4

    root = jax.random.PRNGKey(0)
    k_params, k_q, k_k, k_v, k_b = jax.random.split(root, 5)

    params = init_params(k_params, H)
    query = jax.random.normal(k_q, (B, S, H), jnp.float32)
    key_t = jax.random.normal(k_k, (B, S, H), jnp.float32)
    value = jax.random.normal(k_v, (B, S, H), jnp.float32)
    structure_bias = 0.1 * jax.random.normal(k_b, (B, S, S), jnp.float32)

    out = multi_head_attention(query, key_t, value, structure_bias, params, NH)
    out = jax.block_until_ready(out)

    ref = reference_mha(query, key_t, value, structure_bias, params, NH)
    assert out.shape == (B, S, H)
    # Tolerance sized for bf16 matmul operands vs. the f32 reference.
    assert jnp.allclose(out, ref, atol=5e-2, rtol=5e-2), "mismatch vs reference"

    print("KERNEL_OK")
</pallas_src>

<mosaic_0001>
module attributes {stable_mosaic.version = 11 : i64} {
  func.func @kernel(%arg0: i32, %arg1: i32, %arg2: memref<1x8x128xbf16, #tpu.memory_space<vmem>>, %arg3: memref<1x8x128xbf16, #tpu.memory_space<vmem>>, %arg4: memref<1x8x128xbf16, #tpu.memory_space<vmem>>, %arg5: memref<1x8x8xf32, #tpu.memory_space<vmem>>, %arg6: memref<128x512xbf16, #tpu.memory_space<vmem>>, %arg7: memref<1x512xf32, #tpu.memory_space<vmem>>, %arg8: memref<128x512xbf16, #tpu.memory_space<vmem>>, %arg9: memref<1x512xf32, #tpu.memory_space<vmem>>, %arg10: memref<128x512xbf16, #tpu.memory_space<vmem>>, %arg11: memref<1x512xf32, #tpu.memory_space<vmem>>, %arg12: memref<512x128xbf16, #tpu.memory_space<vmem>>, %arg13: memref<1x128xf32, #tpu.memory_space<vmem>>, %arg14: memref<1x8x128xf32, #tpu.memory_space<vmem>>, %arg15: memref<4x8x128xbf16, #tpu.memory_space<vmem>>, %arg16: memref<4x8x128xbf16, #tpu.memory_space<vmem>>) attributes {dimension_semantics = [#tpu.dimension_semantics<parallel>, #tpu.dimension_semantics<arbitrary>], iteration_bounds = array<i64: 2, 1>, scalar_prefetch = 0 : i64, scratch_operands = 2 : i64, tpu.core_type = #tpu.core_type<tc>, window_params = [{transform_indices = @transform_0, window_bounds = array<i64: 1, 8, 128>}, {transform_indices = @transform_1, window_bounds = array<i64: 1, 8, 128>}, {transform_indices = @transform_2, window_bounds = array<i64: 1, 8, 128>}, {transform_indices = @transform_3, window_bounds = array<i64: 1, 8, 8>}, {pipeline_mode = #tpu.pipeline_mode<synchronous>, transform_indices = @transform_4, window_bounds = array<i64: 128, 512>}, {pipeline_mode = #tpu.pipeline_mode<synchronous>, transform_indices = @transform_5, window_bounds = array<i64: 1, 512>}, {pipeline_mode = #tpu.pipeline_mode<synchronous>, transform_indices = @transform_6, window_bounds = array<i64: 128, 512>}, {pipeline_mode = #tpu.pipeline_mode<synchronous>, transform_indices = @transform_7, window_bounds = array<i64: 1, 512>}, {pipeline_mode = #tpu.pipeline_mode<synchronous>, transform_indices = @transform_8, window_bounds = array<i64: 128, 512>}, {pipeline_mode = #tpu.pipeline_mode<synchronous>, transform_indices = @transform_9, window_bounds = array<i64: 1, 512>}, {pipeline_mode = #tpu.pipeline_mode<synchronous>, transform_indices = @transform_10, window_bounds = array<i64: 512, 128>}, {pipeline_mode = #tpu.pipeline_mode<synchronous>, transform_indices = @transform_11, window_bounds = array<i64: 1, 128>}, {transform_indices = @transform_12, window_bounds = array<i64: 1, 8, 128>}]} {
    %c0_i32 = arith.constant 0 : i32
    %0 = arith.cmpi eq, %arg1, %c0_i32 : i32
    %1 = arith.extui %0 : i1 to i32
    %c0_i32_0 = arith.constant 0 : i32
    %2 = arith.cmpi ne, %1, %c0_i32_0 : i32
    scf.if %2 {
      %c0_29 = arith.constant 0 : index
      %c0_30 = arith.constant 0 : index
      %c0_31 = arith.constant 0 : index
      %46 = vector.load %arg3[%c0_29, %c0_30, %c0_31] : memref<1x8x128xbf16, #tpu.memory_space<vmem>>, vector<1x8x128xbf16>
      %47 = vector.shape_cast %46 : vector<1x8x128xbf16> to vector<8x128xbf16>
      %c0_32 = arith.constant 0 : index
      %c0_33 = arith.constant 0 : index
      %48 = vector.load %arg8[%c0_32, %c0_33] : memref<128x512xbf16, #tpu.memory_space<vmem>>, vector<128x512xbf16>
      %cst_34 = arith.constant dense<0.000000e+00> : vector<8x512xf32>
      %49 = tpu.matmul %47, %48, %cst_34 {dimension_numbers = #tpu.dot_dimension_numbers<[1], [0], [0], [1], [0, 0, 1, 1], [], []>} : vector<8x128xbf16>, vector<128x512xbf16>, vector<8x512xf32> -> vector<8x512xf32>
      %c0_35 = arith.constant 0 : index
      %c0_36 = arith.constant 0 : index
      %50 = vector.load %arg9[%c0_35, %c0_36] : memref<1x512xf32, #tpu.memory_space<vmem>>, vector<1x512xf32>
      %51 = vector.broadcast %50 : vector<1x512xf32> to vector<8x512xf32>
      %52 = arith.addf %49, %51 : vector<8x512xf32>
      %c0_37 = arith.constant 0 : index
      %c0_38 = arith.constant 0 : index
      %c0_39 = arith.constant 0 : index
      %53 = vector.load %arg4[%c0_37, %c0_38, %c0_39] : memref<1x8x128xbf16, #tpu.memory_space<vmem>>, vector<1x8x128xbf16>
      %54 = vector.shape_cast %53 : vector<1x8x128xbf16> to vector<8x128xbf16>
      %c0_40 = arith.constant 0 : index
      %c0_41 = arith.constant 0 : index
      %55 = vector.load %arg10[%c0_40, %c0_41] : memref<128x512xbf16, #tpu.memory_space<vmem>>, vector<128x512xbf16>
      %cst_42 = arith.constant dense<0.000000e+00> : vector<8x512xf32>
      %56 = tpu.matmul %54, %55, %cst_42 {dimension_numbers = #tpu.dot_dimension_numbers<[1], [0], [0], [1], [0, 0, 1, 1], [], []>} : vector<8x128xbf16>, vector<128x512xbf16>, vector<8x512xf32> -> vector<8x512xf32>
      %c0_43 = arith.constant 0 : index
      %c0_44 = arith.constant 0 : index
      %57 = vector.load %arg11[%c0_43, %c0_44] : memref<1x512xf32, #tpu.memory_space<vmem>>, vector<1x512xf32>
      %58 = vector.broadcast %57 : vector<1x512xf32> to vector<8x512xf32>
      %59 = arith.addf %56, %58 : vector<8x512xf32>
      %60 = vector.shape_cast %52 : vector<8x512xf32> to vector<8x4x128xf32>
      %61 = tpu.transpose %60, [1, 0, 2] : vector<8x4x128xf32> -> vector<4x8x128xf32>
      %62 = arith.truncf %61 : vector<4x8x128xf32> to vector<4x8x128xbf16>
      %c0_45 = arith.constant 0 : index
      %c0_46 = arith.constant 0 : index
      %c0_47 = arith.constant 0 : index
      %63 = vector.load %arg15[%c0_45, %c0_46, %c0_47] : memref<4x8x128xbf16, #tpu.memory_space<vmem>>, vector<4x8x128xbf16>
      tpu.vector_store %arg15[%c0_45, %c0_46, %c0_47], %62 {strides = array<i32>} : memref<4x8x128xbf16, #tpu.memory_space<vmem>>, vector<4x8x128xbf16>,
      %64 = vector.shape_cast %59 : vector<8x512xf32> to vector<8x4x128xf32>
      %65 = tpu.transpose %64, [1, 0, 2] : vector<8x4x128xf32> -> vector<4x8x128xf32>
      %66 = arith.truncf %65 : vector<4x8x128xf32> to vector<4x8x128xbf16>
      %c0_48 = arith.constant 0 : index
      %c0_49 = arith.constant 0 : index
      %c0_50 = arith.constant 0 : index
      %67 = vector.load %arg16[%c0_48, %c0_49, %c0_50] : memref<4x8x128xbf16, #tpu.memory_space<vmem>>, vector<4x8x128xbf16>
      tpu.vector_store %arg16[%c0_48, %c0_49, %c0_50], %66 {strides = array<i32>} : memref<4x8x128xbf16, #tpu.memory_space<vmem>>, vector<4x8x128xbf16>,
    } else {
    }
    %c0 = arith.constant 0 : index
    %c0_1 = arith.constant 0 : index
    %c0_2 = arith.constant 0 : index
    %3 = vector.load %arg2[%c0, %c0_1, %c0_2] : memref<1x8x128xbf16, #tpu.memory_space<vmem>>, vector<1x8x128xbf16>
    %4 = vector.shape_cast %3 : vector<1x8x128xbf16> to vector<8x128xbf16>
    %c0_3 = arith.constant 0 : index
    %c0_4 = arith.constant 0 : index
    %5 = vector.load %arg6[%c0_3, %c0_4] : memref<128x512xbf16, #tpu.memory_space<vmem>>, vector<128x512xbf16>
    %cst = arith.constant dense<0.000000e+00> : vector<8x512xf32>
    %6 = tpu.matmul %4, %5, %cst {dimension_numbers = #tpu.dot_dimension_numbers<[1], [0], [0], [1], [0, 0, 1, 1], [], []>} : vector<8x128xbf16>, vector<128x512xbf16>, vector<8x512xf32> -> vector<8x512xf32>
    %c0_5 = arith.constant 0 : index
    %c0_6 = arith.constant 0 : index
    %7 = vector.load %arg7[%c0_5, %c0_6] : memref<1x512xf32, #tpu.memory_space<vmem>>, vector<1x512xf32>
    %8 = vector.broadcast %7 : vector<1x512xf32> to vector<8x512xf32>
    %9 = arith.addf %6, %8 : vector<8x512xf32>
    %cst_7 = arith.constant 0.353553385 : f32
    %10 = vector.broadcast %cst_7 : f32 to vector<8x512xf32>
    %11 = arith.mulf %9, %10 : vector<8x512xf32>
    %12 = arith.truncf %11 : vector<8x512xf32> to vector<8x512xbf16>
    %13 = vector.shape_cast %12 : vector<8x512xbf16> to vector<8x4x128xbf16>
    %14 = tpu.transpose %13, [1, 0, 2] : vector<8x4x128xbf16> -> vector<4x8x128xbf16>
    %c0_8 = arith.constant 0 : index
    %c0_9 = arith.constant 0 : index
    %c0_10 = arith.constant 0 : index
    %15 = vector.load %arg15[%c0_8, %c0_9, %c0_10] : memref<4x8x128xbf16, #tpu.memory_space<vmem>>, vector<4x8x128xbf16>
    "tpu.trace_start"() <{level = 10 : i32, message = "hqd,hkd->hqk"}> : () -> ()
    %cst_11 = arith.constant dense<0.000000e+00> : vector<4x8x8xf32>
    %16 = tpu.matmul %14, %15, %cst_11 {dimension_numbers = #tpu.dot_dimension_numbers<[2], [2], [1], [1], [0, 0, 0, 1, 1, 1], [0], [0]>} : vector<4x8x128xbf16>, vector<4x8x128xbf16>, vector<4x8x8xf32> -> vector<4x8x8xf32>
    "tpu.trace_stop"() : () -> ()
    %c0_12 = arith.constant 0 : index
    %c0_13 = arith.constant 0 : index
    %c0_14 = arith.constant 0 : index
    %17 = vector.load %arg5[%c0_12, %c0_13, %c0_14] : memref<1x8x8xf32, #tpu.memory_space<vmem>>, vector<1x8x8xf32>
    %18 = vector.shape_cast %17 : vector<1x8x8xf32> to vector<8x8xf32>
    %19 = vector.shape_cast %18 : vector<8x8xf32> to vector<1x8x8xf32>
    %20 = vector.broadcast %19 : vector<1x8x8xf32> to vector<4x8x8xf32>
    %21 = arith.addf %16, %20 : vector<4x8x8xf32>
    %cst_15 = arith.constant dense<0xFF800000> : vector<4x8xf32>
    %22 = vector.multi_reduction <maximumf>, %21, %cst_15 [2] : vector<4x8x8xf32> to vector<4x8xf32>
    %23 = vector.shape_cast %22 : vector<4x8xf32> to vector<4x8x1xf32>
    %24 = vector.broadcast %23 : vector<4x8x1xf32> to vector<4x8x8xf32>
    %25 = arith.subf %21, %24 : vector<4x8x8xf32>
    %26 = math.exp %25 : vector<4x8x8xf32>
    %cst_16 = arith.constant dense<0.000000e+00> : vector<4x8xf32>
    %27 = vector.multi_reduction <add>, %26, %cst_16 [2] : vector<4x8x8xf32> to vector<4x8xf32>
    %28 = vector.shape_cast %27 : vector<4x8xf32> to vector<4x8x1xf32>
    %29 = tpu.reciprocal %28 {approx = true} : vector<4x8x1xf32> -> vector<4x8x1xf32>
    %30 = vector.broadcast %29 : vector<4x8x1xf32> to vector<4x8x8xf32>
    %31 = arith.mulf %26, %30 : vector<4x8x8xf32>
    %32 = arith.truncf %31 : vector<4x8x8xf32> to vector<4x8x8xbf16>
    %c0_17 = arith.constant 0 : index
    %c0_18 = arith.constant 0 : index
    %c0_19 = arith.constant 0 : index
    %33 = vector.load %arg16[%c0_17, %c0_18, %c0_19] : memref<4x8x128xbf16, #tpu.memory_space<vmem>>, vector<4x8x128xbf16>
    "tpu.trace_start"() <{level = 10 : i32, message = "hqk,hkd->hqd"}> : () -> ()
    %cst_20 = arith.constant dense<0.000000e+00> : vector<4x8x128xf32>
    %34 = tpu.matmul %32, %33, %cst_20 {dimension_numbers = #tpu.dot_dimension_numbers<[2], [1], [1], [2], [0, 0, 0, 1, 1, 2], [0], [0]>} : vector<4x8x8xbf16>, vector<4x8x128xbf16>, vector<4x8x128xf32> -> vector<4x8x128xf32>
    "tpu.trace_stop"() : () -> ()
    %35 = tpu.transpose %34, [1, 0, 2] : vector<4x8x128xf32> -> vector<8x4x128xf32>
    %36 = vector.shape_cast %35 : vector<8x4x128xf32> to vector<8x512xf32>
    %37 = arith.truncf %36 : vector<8x512xf32> to vector<8x512xbf16>
    %c0_21 = arith.constant 0 : index
    %c0_22 = arith.constant 0 : index
    %38 = vector.load %arg12[%c0_21, %c0_22] : memref<512x128xbf16, #tpu.memory_space<vmem>>, vector<512x128xbf16>
    %cst_23 = arith.constant dense<0.000000e+00> : vector<8x128xf32>
    %39 = tpu.matmul %37, %38, %cst_23 {dimension_numbers = #tpu.dot_dimension_numbers<[1], [0], [0], [1], [0, 0, 1, 1], [], []>} : vector<8x512xbf16>, vector<512x128xbf16>, vector<8x128xf32> -> vector<8x128xf32>
    %c0_24 = arith.constant 0 : index
    %c0_25 = arith.constant 0 : index
    %40 = vector.load %arg13[%c0_24, %c0_25] : memref<1x128xf32, #tpu.memory_space<vmem>>, vector<1x128xf32>
    %41 = vector.broadcast %40 : vector<1x128xf32> to vector<8x128xf32>
    %42 = arith.addf %39, %41 : vector<8x128xf32>
    %c0_26 = arith.constant 0 : index
    %c0_27 = arith.constant 0 : index
    %c0_28 = arith.constant 0 : index
    %43 = vector.load %arg14[%c0_26, %c0_27, %c0_28] : memref<1x8x128xf32, #tpu.memory_space<vmem>>, vector<1x8x128xf32>
    %44 = vector.shape_cast %43 : vector<1x8x128xf32> to vector<8x128xf32>
    %45 = vector.shape_cast %42 : vector<8x128xf32> to vector<1x8x128xf32>
    tpu.vector_store %arg14[%c0_26, %c0_27, %c0_28], %45 {strides = array<i32>} : memref<1x8x128xf32, #tpu.memory_space<vmem>>, vector<1x8x128xf32>,
    return
  }
  func.func @transform_0(%arg0: i32, %arg1: i32) -> (i32, i32, i32) {
    %c0_i32 = arith.constant 0 : i32
    %c0_i32_0 = arith.constant 0 : i32
    return %arg0, %arg1, %c0_i32 : i32, i32, i32
  }
  func.func @transform_1(%arg0: i32, %arg1: i32) -> (i32, i32, i32) {
    %c0_i32 = arith.constant 0 : i32
    %c0_i32_0 = arith.constant 0 : i32
    %c0_i32_1 = arith.constant 0 : i32
    return %arg0, %c0_i32, %c0_i32_0 : i32, i32, i32
  }
  func.func @transform_2(%arg0: i32, %arg1: i32) -> (i32, i32, i32) {
    %c0_i32 = arith.constant 0 : i32
    %c0_i32_0 = arith.constant 0 : i32
    %c0_i32_1 = arith.constant 0 : i32
    return %arg0, %c0_i32, %c0_i32_0 : i32, i32, i32
  }
  func.func @transform_3(%arg0: i32, %arg1: i32) -> (i32, i32, i32) {
    %c0_i32 = arith.constant 0 : i32
    %c0_i32_0 = arith.constant 0 : i32
    return %arg0, %arg1, %c0_i32 : i32, i32, i32
  }
  func.func @transform_4(%arg0: i32, %arg1: i32) -> (i32, i32) {
    %c0_i32 = arith.constant 0 : i32
    %c0_i32_0 = arith.constant 0 : i32
    %c0_i32_1 = arith.constant 0 : i32
    return %c0_i32, %c0_i32_0 : i32, i32
  }
  func.func @transform_5(%arg0: i32, %arg1: i32) -> (i32, i32) {
    %c0_i32 = arith.constant 0 : i32
    %c0_i32_0 = arith.constant 0 : i32
    %c0_i32_1 = arith.constant 0 : i32
    return %c0_i32, %c0_i32_0 : i32, i32
  }
  func.func @transform_6(%arg0: i32, %arg1: i32) -> (i32, i32) {
    %c0_i32 = arith.constant 0 : i32
    %c0_i32_0 = arith.constant 0 : i32
    %c0_i32_1 = arith.constant 0 : i32
    return %c0_i32, %c0_i32_0 : i32, i32
  }
  func.func @transform_7(%arg0: i32, %arg1: i32) -> (i32, i32) {
    %c0_i32 = arith.constant 0 : i32
    %c0_i32_0 = arith.constant 0 : i32
    %c0_i32_1 = arith.constant 0 : i32
    return %c0_i32, %c0_i32_0 : i32, i32
  }
  func.func @transform_8(%arg0: i32, %arg1: i32) -> (i32, i32) {
    %c0_i32 = arith.constant 0 : i32
    %c0_i32_0 = arith.constant 0 : i32
    %c0_i32_1 = arith.constant 0 : i32
    return %c0_i32, %c0_i32_0 : i32, i32
  }
  func.func @transform_9(%arg0: i32, %arg1: i32) -> (i32, i32) {
    %c0_i32 = arith.constant 0 : i32
    %c0_i32_0 = arith.constant 0 : i32
    %c0_i32_1 = arith.constant 0 : i32
    return %c0_i32, %c0_i32_0 : i32, i32
  }
  func.func @transform_10(%arg0: i32, %arg1: i32) -> (i32, i32) {
    %c0_i32 = arith.constant 0 : i32
    %c0_i32_0 = arith.constant 0 : i32
    %c0_i32_1 = arith.constant 0 : i32
    return %c0_i32, %c0_i32_0 : i32, i32
  }
  func.func @transform_11(%arg0: i32, %arg1: i32) -> (i32, i32) {
    %c0_i32 = arith.constant 0 : i32
    %c0_i32_0 = arith.constant 0 : i32
    %c0_i32_1 = arith.constant 0 : i32
    return %c0_i32, %c0_i32_0 : i32, i32
  }
  func.func @transform_12(%arg0: i32, %arg1: i32) -> (i32, i32, i32) {
    %c0_i32 = arith.constant 0 : i32
    %c0_i32_0 = arith.constant 0 : i32
    return %arg0, %arg1, %c0_i32 : i32, i32, i32
  }
}

</mosaic_0001>

<bundles_post_ra>
// kernel: tpu_custom_call.1
= control target key start
LH: loop header
LB: loop body
LE: loop exit
PB: predicated region body
PF: predicated region fallthrough
CT: control target
= control target key end

     0   :  { %s4670_s0 = inlined_call_operand.hbm [shape: bf16[2,8,128], index: 0, kind: input, shape index: {}]   ;;  %s4671_s1 = inlined_call_operand.hbm [shape: bf16[2,8,128], index: 1, kind: input, shape index: {}]   ;;  %s4672_s2 = inlined_call_operand.hbm [shape: bf16[2,8,128], index: 2, kind: input, shape index: {}]   ;;  %s4673_s3 = inlined_call_operand.hbm [shape: f32[2,8,8], index: 3, kind: input, shape index: {}]   ;;  %s4674_s4 = inlined_call_operand.hbm [shape: bf16[128,512], index: 4, kind: input, shape index: {}]   ;;  %s4675_s5 = inlined_call_operand.vmem [shape: f32[1,512], index: 5, kind: input, shape index: {}]   ;;  %s4676_s6 = inlined_call_operand.hbm [shape: bf16[128,512], index: 6, kind: input, shape index: {}]   ;;  %s4677_s7 = inlined_call_operand.vmem [shape: f32[1,512], index: 7, kind: input, shape index: {}]   ;;  %s4678_s8 = inlined_call_operand.hbm [shape: bf16[128,512], index: 8, kind: input, shape index: {}]   ;;  %s4679_s9 = inlined_call_operand.vmem [shape: f32[1,512], index: 9, kind: input, shape index: {}]   ;;  %s4680_s10 = inlined_call_operand.hbm [shape: bf16[512,128], index: 10, kind: input, shape index: {}]   ;;  %s4681_s11 = inlined_call_operand.vmem [shape: f32[1,128], index: 11, kind: input, shape index: {}]   ;;  %s4682_s12 = inlined_call_operand.hbm [shape: f32[2,8,128], index: 12, kind: output, shape index: {}]  }
   0x1   :  { %4705 = sst [smem:[#allocation34_spill]] %s4671_s1 }
   0x2   :  { %4706 = sst [smem:[#allocation35_spill]] %s4674_s4 }
   0x3   :  { %4707 = sst [smem:[#allocation36_spill]] %s4675_s5 }
   0x4   :  { %4708 = sst [smem:[#allocation37_spill]] %s4676_s6 }
   0x5   :  { %4709 = sst [smem:[#allocation38_spill]] %s4677_s7 }
   0x6   :  { %4710 = sst [smem:[#allocation39_spill]] %s4679_s9 }
   0x7   :  { %4711 = sst [smem:[#allocation40_spill]] %s4681_s11 }
   0x8   :  { %4712 = sst [smem:[#allocation41_spill]] %s4682_s12 }
   0x9   :  { %17 = vsyncpa [#allocation5], 0 }
   0xa   :  { %19 = vsyncpa [#allocation5 + $0x1], 0 }
   0xb   :  { %20 = vsyncpa [#allocation8], 0 }
   0xc   :  { %22 = vsyncpa [#allocation8 + $0x1], 0 }
   0xd   :  { %23 = vsyncpa [#allocation11], 0 }
   0xe   :  { %25 = vsyncpa [#allocation11 + $0x1], 0 }
   0xf   :  { %26 = vsyncpa [#allocation14], 0 }
  0x10   :  { %27 = vsyncpa [#allocation17], 0 }
  0x11   :  { %28 = vsyncpa [#allocation6], 0 }
  0x12   :  { %30 = vsyncpa [#allocation6 + $0x1], 0  ;;  %s4093_s21 = smov 0   ;;  %s4095_s22 = smov 0  }
  0x13   :  { %s4097_s23 = smov 0   ;;  %s4099_s24 = smov 0  }
  0x14   :  { %s4101_s25 = smov 0   ;;  %s4103_s26 = smov 0  }
  0x15 LB: > { %4713 = sst [smem:[#allocation26_spill]] %s3988_s21  ;;  %s4124_s27 = sadd.s32 4294967295, %s4008_s26   ;;  %s4008_s26 = sphi %s4103_s26, %s36_s26   ;;  %s4004_s25 = sphi %s4101_s25, %s4768_s25   ;;  %s4000_s24 = sphi %s4099_s24, %s4767_s24   ;;  %s3996_s23 = sphi %s4097_s23, %s4763_s23   ;;  %s3992_s22 = sphi %s4095_s22, %s4766_s22   ;;  %s3988_s21 = sphi %s4093_s21, %s4765_s21  }
  0x16   : > { %4714 = sst [smem:[#allocation27_spill]] %s3996_s23  ;;  %s3057_s28 = sadd.s32 4294967294, %s4008_s26  }
  0x17   : > { %4715 = sst [smem:[#allocation28_spill]] %s4000_s24  ;;  %p70_p0 = scmp.ne.s32.totalorder %s3992_s22, %s3988_s21 }
  0x18   : > { %4716 = sst [smem:[#allocation29_spill]] %s4124_s27  ;;  %p4686_p1 = scmp.eq.s32.totalorder %s4124_s27, 0 }
  0x19   : > { %p350_p3 = scmp.eq.s32.totalorder %s3057_s28, 1  ;;  %p3058_p5 = scmp.ge.s32.totalorder %s4008_s26, 1 }
  0x1a   : > { %p4133_p4 = por %p4686_p1, %p70_p0  ;;  %p357_p7 = scmp.lt.s32.totalorder %s4008_s26, 3 }
  0x1b   : > { %p4138_p6 = por %p350_p3, %p70_p0  ;;  %s4010_s14 = smov [#allocation12]  }
  0x1c   : > { %s4717_s29 = scalar_select %p4133_p4, 1, 0 }
  0x1d   : > { %s4718_s30 = scalar_select %p4138_p6, 1, 0 }
  0x1e   : > { %p4143_p8 = pnand %p3058_p5, %p357_p7  ;;  %s369_s15 = sshll.u32 %s4010_s14, 4  ;;  %s4147_s15 = int_to_ptr.vmem [resolvable:$true] %s369_s15 }
  0x1f   : > { %4719 = sst [smem:[#allocation30_spill]] %s4718_s30  ;;  %s4011_s17 = smov [#allocation13]  }
  0x20   : > { %s4720_s13 = scalar_select %p4143_p8, 1, 0 }
  0x21   : > { %p3381_p9 = pneg %p4143_p8  ;;  %s385_s18 = sshll.u32 %s4011_s17, 4  ;;  %s4158_s18 = int_to_ptr.vmem [resolvable:$true] %s385_s18 }
  0x22   : > { %s4722_s4 = sld [smem:[#allocation35_spill]] }
  0x23   : > { %p4154_p11 = pnand %p3381_p9, %p4686_p1 }
  0x25   : > { %s4721_s16 = scalar_select %p4154_p11, 1, 0 }
  0x26   : > { %p4168_p13 = pneg %p4154_p11 }
  0x28   : > { %s3674_s28 = scalar_lea.hbm %s4722_s4, 4096 }
  0x29   : > { %p3675_p12 = scmp.ne.s32.totalorder %s4722_s4, %s3674_s28  ;;  %p3681_p5 = scmp.lt.u32.totalorder %s3674_s28, %s4722_s4 }
  0x2a   : > { %s4723_s21 = scalar_select %p4168_p13, 1, 0 }
  0x2b   : > { %p3677_p0 = pnand %p4168_p13, %p3675_p12 }
  0x2d   : > { %p3678_p3 = pneg %p3677_p0 }
  0x2f   : > { %p3683_p7 = pnand %p3681_p5, %p3678_p3 }
  0x31   : > { %3686 = shalt.err (!%p3683_p7)
}
  0x32   : > { %s3687_s30 = scalar_lea.vmem %s4147_s15, 4096  ;;  %p3695_p2 = scmp.lt.s32.totalorder %s4147_s15, %s4147_s15 }
  0x33   : > { %p3688_p9 = scmp.ne.s32.totalorder %s4147_s15, %s3687_s30  ;;  %p3696_p6 = scmp.lt.s32.totalorder %s3687_s30, %s3687_s30 }
  0x35   : > { %p3690_p10 = pnand %p3688_p9, %p4168_p13  ;;  %p3697_p12 = por %p3696_p6, %p3695_p2 }
  0x37   : > { %p3691_p1 = pneg %p3690_p10 }
  0x39   : > { %p3698_p0 = pnand %p3697_p12, %p3691_p1 }
  0x3b   : > { %3701 = shalt.err (!%p3698_p0)
}
  0x3c   : > { %s4687_s19 = smov 256   ;;  %s4688_s12 = smov 16  }
  0x3d   : > { %3384 = dma.hbm_to_vmem [thread:$0]  (!%p4154_p11), %s4722_s4, 4096, %s4147_s15, [#allocation11], %s4687_s19, %s4687_s19, %s4688_s12  }
  0x3e   : > { %s4724_s6 = sld [smem:[#allocation37_spill]] }
  0x44   : > { %s3702_s30 = scalar_lea.hbm %s4724_s6, 4096 }
  0x45   : > { %p3703_p1 = scmp.ne.s32.totalorder %s4724_s6, %s3702_s30  ;;  %p3709_p10 = scmp.lt.u32.totalorder %s3702_s30, %s4724_s6 }
  0x47   : > { %p3705_p2 = pnand %p3703_p1, %p4168_p13 }
  0x49   : > { %p3706_p6 = pneg %p3705_p2 }
  0x4b   : > { %p3711_p3 = pnand %p3709_p10, %p3706_p6 }
  0x4d   : > { %3714 = shalt.err (!%p3711_p3)
}
  0x4e   : > { %s3715_s15 = scalar_lea.vmem %s4158_s18, 4096  ;;  %p3723_p12 = scmp.lt.s32.totalorder %s4158_s18, %s4158_s18 }
  0x4f   : > { %p3716_p5 = scmp.ne.s32.totalorder %s4158_s18, %s3715_s15  ;;  %p3724_p0 = scmp.lt.s32.totalorder %s3715_s15, %s3715_s15 }
  0x51   : > { %p3718_p7 = pnand %p3716_p5, %p4168_p13  ;;  %p3725_p1 = por %p3724_p0, %p3723_p12 }
  0x53   : > { %p3719_p9 = pneg %p3718_p7 }
  0x55   : > { %p3726_p2 = pnand %p3725_p1, %p3719_p9 }
  0x57   : > { %3729 = shalt.err (!%p3726_p2)
}
  0x58   : > { %3387 = dma.hbm_to_vmem [thread:$0]  (!%p4154_p11), %s4724_s6, 4096, %s4158_s18, [#allocation14], %s4687_s19, %s4687_s19, %s4688_s12  }
  0x59   : > { %s48_s11 = sadd.s32 1, %s4004_s25  ;;  %s57_s24 = sadd.s32 1, %s3996_s23 }
  0x5a   : > { %p50_p6 = scmp.ge.s32.totalorder %s48_s11, 2  ;;  %p64_p10 = scmp.ne.s32.totalorder %s3996_s23, %s3992_s22 }
  0x5b   : > { %p65_p3 = scmp.eq.s32.totalorder %s4008_s26, 0  ;;  %p3415_p5 = scmp.lt.s32.totalorder %s4008_s26, 2 }
  0x5c   : > { %s4770_s11 = smov (%p50_p6, %s48_s11), 0  ;;  %p4726_p9 = scmp.eq.s32.totalorder %s4124_s27, 1 }
  0x5d   : > { %4725 = sst [smem:[#allocation31_spill]] %s4770_s11  ;;  %p66_p7 = por %p65_p3, %p64_p10 }
  0x5e   : > { %p4228_p12 = por %p4726_p9, %p64_p10  ;;  %s52_s28 = ssub.s32 %s4004_s25, %s4770_s11 }
  0x5f   : > { %s4235_s18 = sand.u32 1, %s3996_s23   ;;  %p55_p0 = scmp.eq.s32.totalorder %s52_s28, 0 }
  0x60   : > { %s4727_s20 = scalar_select %p4228_p12, 1, 0 }
  0x61   : > { %s4238_s14 = sshll.u32 %s4235_s18, 2  ;;  %s4241_s17 = sshll.u32 %s4004_s25, 6 }
  0x62   : > { %4728 = sst [smem:[#allocation32_spill]] %s4727_s20  ;;  %p4243_p1 = pnand %p3415_p5, %p66_p7 }
  0x63   : > { %s4248_s15 = scalar_select %p55_p0, %s3996_s23, %s57_s24  }
  0x64   : > { %s4729_s30 = scalar_select %p4243_p1, 1, 0 }
  0x65   : > { %4730 = sst [smem:[#allocation33_spill]] %s4248_s15  ;;  %s4693_s5 = sand.u32 1, %s4008_s26  }
  0x66   : > { %s4731_s1 = sld [smem:[#allocation34_spill]]  ;;  %s457_s28 = scalar_lea.vmem [#allocation7], %s4238_s14 }
  0x67   : > { %s464_s4 = sshll.u32 %s457_s28, 4  ;;  %s4262_s6 = scalar_lea.sflag [#allocation8], %s4693_s5  ;;  %s4258_s4 = int_to_ptr.vmem [resolvable:$true] %s464_s4 }
  0x68   : > { %p4268_p6 = pneg %p4243_p1 }
  0x6c   : > { %s4255_s12 = scalar_lea.hbm %s4731_s1, %s4241_s17  ;;  %s3735_s28 = scalar_lea.hbm %s4731_s1, 128 }
  0x6d   : > { %s3730_s11 = scalar_lea.hbm %s4255_s12, 64  ;;  %p3736_p5 = scmp.lt.u32.totalorder %s4255_s12, %s4731_s1 }
  0x6e   : > { %p3731_p2 = scmp.ne.s32.totalorder %s4255_s12, %s3730_s11  ;;  %p3737_p7 = scmp.lt.u32.totalorder %s3735_s28, %s3730_s11 }
  0x6f   : > { %p3739_p0 = scmp.lt.u32.totalorder %s3730_s11, %s4255_s12 }
  0x70   : > { %p3733_p10 = pnand %p4268_p6, %p3731_p2  ;;  %p3738_p9 = por %p3737_p7, %p3736_p5 }
  0x72   : > { %p3734_p3 = pneg %p3733_p10  ;;  %p3740_p12 = por %p3739_p0, %p3738_p9 }
  0x74   : > { %p3741_p4 = pnand %p3740_p12, %p3734_p3 }
  0x76   : > { %3744 = shalt.err (!%p3741_p4)
}
  0x77   : > { %s3745_s5 = scalar_lea.vmem %s4258_s4, 64  ;;  %s4014_s19 = smov [#allocation7]  }
  0x78   : > { %p3746_p2 = scmp.ne.s32.totalorder %s4258_s4, %s3745_s5  ;;  %s3750_s9 = sshll.u32 %s4014_s19, 4  ;;  %s3751_s9 = int_to_ptr.vmem [resolvable:$false] %s3750_s9 }
  0x79   : > { %s3752_s23 = scalar_lea.vmem %s3751_s9, 128  ;;  %p3753_p11 = scmp.lt.s32.totalorder %s4258_s4, %s3751_s9 }
  0x7a   : > { %p3748_p10 = pnand %p3746_p2, %p4268_p6  ;;  %p3754_p13 = scmp.lt.s32.totalorder %s3752_s23, %s3745_s5 }
  0x7c   : > { %p3749_p8 = pneg %p3748_p10  ;;  %p3755_p5 = por %p3754_p13, %p3753_p11 }
  0x7e   : > { %p3756_p7 = pnand %p3755_p5, %p3749_p8 }
  0x80   : > { %3759 = shalt.err (!%p3756_p7)
}
  0x81   : > { %3400 = dma.hbm_to_vmem [thread:$0]  (!%p4243_p1), %s4255_s12, 64, %s4258_s4, %s4262_s6  }
  0x82   : > { %s4015_s11 = smov [#allocation15]   ;;  %s4016_s28 = smov [#allocation16]  }
  0x83   : > { %s401_s15 = sshll.u32 %s4015_s11, 4  ;;  %s417_s1 = sshll.u32 %s4016_s28, 4  ;;  %s402_s15 = int_to_ptr.vmem [resolvable:$true] %s401_s15  ;;  %s4292_s1 = int_to_ptr.vmem [resolvable:$true] %s417_s1 }
  0x84   : > { %s3760_s5 = scalar_lea.hbm %s4678_s8, 4096  ;;  %p4733_p8 = scmp.ne.s32.totalorder %s4723_s21, 0 }
  0x85   : > { %p3761_p4 = scmp.ne.s32.totalorder %s4678_s8, %s3760_s5  ;;  %p3767_p12 = scmp.lt.u32.totalorder %s3760_s5, %s4678_s8 }
  0x87   : > { %p3763_p11 = pnand %p3761_p4, %p4733_p8 }
  0x89   : > { %p3764_p13 = pneg %p3763_p11 }
  0x8b   : > { %p3769_p3 = pnand %p3767_p12, %p3764_p13 }
  0x8d   : > { %3772 = shalt.err (!%p3769_p3)
}
  0x8e   : > { %s3773_s12 = scalar_lea.vmem %s402_s15, 4096  ;;  %p3781_p10 = scmp.lt.s32.totalorder %s402_s15, %s402_s15 }
  0x8f   : > { %p3774_p9 = scmp.ne.s32.totalorder %s402_s15, %s3773_s12  ;;  %p3782_p5 = scmp.lt.s32.totalorder %s3773_s12, %s3773_s12 }
  0x91   : > { %p3776_p0 = pnand %p3774_p9, %p4733_p8  ;;  %p3783_p7 = por %p3782_p5, %p3781_p10 }
  0x93   : > { %p3777_p2 = pneg %p3776_p0 }
  0x95   : > { %p3784_p1 = pnand %p3783_p7, %p3777_p2 }
  0x97   : > { %3787 = shalt.err (!%p3784_p1)
}
  0x98   : > { %p4734_p4 = scmp.ne.s32.totalorder %s4721_s16, 0  ;;  %s4735_s20 = smov 16  }
  0x99   : > { %s4736_s11 = smov 256   ;;  %s3788_s5 = scalar_lea.hbm %s4680_s10, 4096 }
  0x9a   : > { %3390 = dma.hbm_to_vmem [thread:$0]  (!%p4734_p4), %s4678_s8, 4096, %s402_s15, [#allocation14], %s4736_s11, %s4736_s11, %s4735_s20  }
  0x9b   : > { %p3789_p11 = scmp.ne.s32.totalorder %s4680_s10, %s3788_s5  ;;  %p3795_p12 = scmp.lt.u32.totalorder %s3788_s5, %s4680_s10 }
  0x9d   : > { %p3791_p1 = pnand %p3789_p11, %p4733_p8 }
  0x9f   : > { %p3792_p13 = pneg %p3791_p1 }
  0xa1   : > { %p3797_p3 = pnand %p3795_p12, %p3792_p13 }
  0xa3   : > { %3800 = shalt.err (!%p3797_p3)
}
  0xa4   : > { %s3801_s15 = scalar_lea.vmem %s4292_s1, 4096  ;;  %p3809_p10 = scmp.lt.s32.totalorder %s4292_s1, %s4292_s1 }
  0xa5   : > { %p3802_p9 = scmp.ne.s32.totalorder %s4292_s1, %s3801_s15  ;;  %p3810_p5 = scmp.lt.s32.totalorder %s3801_s15, %s3801_s15 }
  0xa7   : > { %p3804_p0 = pnand %p3802_p9, %p4733_p8  ;;  %p3811_p7 = por %p3810_p5, %p3809_p10 }
  0xa9   : > { %p3805_p2 = pneg %p3804_p0 }
  0xab   : > { %p3812_p11 = pnand %p3811_p7, %p3805_p2 }
  0xad   : > { %3815 = shalt.err (!%p3812_p11)
}
  0xae   : > { %s4017_s20 = smov 64   ;;  %s4018_s27 = smov 4  }
  0xaf   : > { %3393 = dma.hbm_to_vmem [thread:$0]  (!%p4734_p4), %s4680_s10, 4096, %s4292_s1, [#allocation17], %s4017_s20, %s4017_s20, %s4018_s27  }
  0xb0   : > { %s4342_s19 = scalar_lea.hbm %s4670_s0, %s4241_s17  ;;  %s438_s9 = scalar_lea.vmem [#allocation4], %s4238_s14 }
  0xb1   : > { %s446_s5 = sshll.u32 %s438_s9, 4  ;;  %s435_s23 = scalar_lea.sflag [#allocation5], %s4235_s18  ;;  %s447_s5 = int_to_ptr.vmem [resolvable:$true] %s446_s5 }
  0xb2   : > { %s3816_s4 = scalar_lea.hbm %s4342_s19, 64  ;;  %s3821_s12 = scalar_lea.hbm %s4670_s0, 128 }
  0xb3   : > { %p3817_p8 = scmp.ne.s32.totalorder %s4342_s19, %s3816_s4  ;;  %p3822_p4 = scmp.lt.u32.totalorder %s4342_s19, %s4670_s0 }
  0xb4   : > { %p3823_p12 = scmp.lt.u32.totalorder %s3821_s12, %s3816_s4  ;;  %p3825_p9 = scmp.lt.u32.totalorder %s3816_s4, %s4342_s19 }
  0xb5   : > { %p3819_p1 = pnand %p3817_p8, %p4268_p6 }
  0xb6   : > { %p3824_p3 = por %p3823_p12, %p3822_p4 }
  0xb7   : > { %p3820_p13 = pneg %p3819_p1 }
  0xb8   : > { %p3826_p0 = por %p3825_p9, %p3824_p3 }
  0xba   : > { %p3827_p2 = pnand %p3826_p0, %p3820_p13 }
  0xbc   : > { %3830 = shalt.err (!%p3827_p2)
}
  0xbd   : > { %s3831_s27 = scalar_lea.vmem %s447_s5, 64  ;;  %s4019_s11 = smov [#allocation4]  }
  0xbe   : > { %p3832_p10 = scmp.ne.s32.totalorder %s447_s5, %s3831_s27  ;;  %s3836_s7 = sshll.u32 %s4019_s11, 4  ;;  %s3837_s7 = int_to_ptr.vmem [resolvable:$false] %s3836_s7 }
  0xbf   : > { %s3838_s21 = scalar_lea.vmem %s3837_s7, 128  ;;  %p3839_p11 = scmp.lt.s32.totalorder %s447_s5, %s3837_s7 }
  0xc0   : > { %p3834_p5 = pnand %p3832_p10, %p4268_p6  ;;  %p3840_p8 = scmp.lt.s32.totalorder %s3838_s21, %s3831_s27 }
  0xc2   : > { %p3835_p7 = pneg %p3834_p5  ;;  %p3841_p1 = por %p3840_p8, %p3839_p11 }
  0xc4   : > { %p3842_p4 = pnand %p3841_p1, %p3835_p7 }
  0xc6   : > { %3845 = shalt.err (!%p3842_p4)
}
  0xc7   : > { %p4737_p12 = scmp.ne.s32.totalorder %s4729_s30, 0  ;;  %s4367_s4 = scalar_lea.hbm %s4672_s2, %s4241_s17 }
  0xc8   : > { %s475_s16 = scalar_lea.vmem [#allocation9], %s4238_s14  ;;  %s3070_s12 = sshll.u32 %s4235_s18, 3 }
  0xc9   : > { %3397 = dma.hbm_to_vmem [thread:$0]  (!%p4737_p12), %s4342_s19, 64, %s447_s5, %s435_s23  }
  0xca   : > { %s482_s1 = sshll.u32 %s475_s16, 4  ;;  %s3846_s15 = scalar_lea.hbm %s4367_s4, 64  ;;  %s483_s1 = int_to_ptr.vmem [resolvable:$true] %s482_s1 }
  0xcb   : > { %p3847_p13 = scmp.ne.s32.totalorder %s4367_s4, %s3846_s15  ;;  %s3851_s5 = scalar_lea.hbm %s4672_s2, 128 }
  0xcc   : > { %p3852_p0 = scmp.lt.u32.totalorder %s4367_s4, %s4672_s2  ;;  %p3853_p2 = scmp.lt.u32.totalorder %s3851_s5, %s3846_s15 }
  0xcd   : > { %p3849_p3 = pnand %p3847_p13, %p4268_p6  ;;  %p3855_p5 = scmp.lt.u32.totalorder %s3846_s15, %s4367_s4 }
  0xce   : > { %p3854_p10 = por %p3853_p2, %p3852_p0 }
  0xcf   : > { %p3850_p9 = pneg %p3849_p3 }
  0xd0   : > { %p3856_p7 = por %p3855_p5, %p3854_p10 }
  0xd2   : > { %p3857_p11 = pnand %p3856_p7, %p3850_p9 }
  0xd4   : > { %3860 = shalt.err (!%p3857_p11)
}
  0xd5   : > { %s3861_s14 = scalar_lea.vmem %s483_s1, 64  ;;  %s4020_s27 = smov [#allocation9]  }
  0xd6   : > { %p3862_p8 = scmp.ne.s32.totalorder %s483_s1, %s3861_s14  ;;  %s3866_s11 = sshll.u32 %s4020_s27, 4  ;;  %s3867_s11 = int_to_ptr.vmem [resolvable:$false] %s3866_s11 }
  0xd7   : > { %s3868_s7 = scalar_lea.vmem %s3867_s11, 128  ;;  %p3869_p13 = scmp.lt.s32.totalorder %s483_s1, %s3867_s11 }
  0xd8   : > { %p3864_p1 = pnand %p3862_p8, %p4268_p6  ;;  %p3870_p3 = scmp.lt.s32.totalorder %s3868_s7, %s3861_s14 }
  0xda   : > { %p3865_p4 = pneg %p3864_p1  ;;  %p3871_p12 = por %p3870_p3, %p3869_p13 }
  0xdc   : > { %p3872_p0 = pnand %p3871_p12, %p3865_p4 }
  0xde   : > { %3875 = shalt.err (!%p3872_p0)
}
  0xdf   : > { %p4738_p2 = scmp.ne.s32.totalorder %s4729_s30, 0  ;;  %s3071_s21 = sshll.u32 %s4004_s25, 7 }
  0xe0   : > { %s4393_s16 = scalar_lea.hbm %s4673_s3, %s3071_s21  ;;  %s493_s15 = scalar_lea.vmem [#allocation10], %s3070_s12 }
  0xe1   : > { %3403 = dma.hbm_to_vmem [thread:$0]  (!%p4738_p2), %s4367_s4, 64, %s483_s1, %s4262_s6  }
  0xe2   : > { %s501_s20 = sshll.u32 %s493_s15, 4  ;;  %s4739_s19 = sand.u32 1, %s4008_s26   ;;  %s502_s20 = int_to_ptr.vmem [resolvable:$true] %s501_s20 }
  0xe3   : > { %s490_s5 = scalar_lea.sflag [#allocation11], %s4739_s19  ;;  %s3876_s23 = scalar_lea.hbm %s4393_s16, 128 }
  0xe4   : > { %p3877_p12 = scmp.ne.s32.totalorder %s4393_s16, %s3876_s23  ;;  %s3881_s1 = scalar_lea.hbm %s4673_s3, 256 }
  0xe5   : > { %p3882_p5 = scmp.lt.u32.totalorder %s4393_s16, %s4673_s3  ;;  %p3883_p7 = scmp.lt.u32.totalorder %s3881_s1, %s3876_s23 }
  0xe6   : > { %p3879_p9 = pnand %p3877_p12, %p4268_p6  ;;  %p3885_p8 = scmp.lt.u32.totalorder %s3876_s23, %s4393_s16 }
  0xe7   : > { %p3884_p11 = por %p3883_p7, %p3882_p5 }
  0xe8   : > { %p3880_p10 = pneg %p3879_p9 }
  0xe9   : > { %p3886_p1 = por %p3885_p8, %p3884_p11 }
  0xeb   : > { %p3887_p4 = pnand %p3886_p1, %p3880_p10 }
  0xed   : > { %3890 = shalt.err (!%p3887_p4)
}
  0xee   : > { %s3891_s12 = scalar_lea.vmem %s502_s20, 128  ;;  %s4021_s14 = smov [#allocation10]  }
  0xef   : > { %p3892_p13 = scmp.ne.s32.totalorder %s502_s20, %s3891_s12  ;;  %s3896_s27 = sshll.u32 %s4021_s14, 4  ;;  %s3897_s27 = int_to_ptr.vmem [resolvable:$false] %s3896_s27 }
  0xf0   : > { %s3898_s11 = scalar_lea.vmem %s3897_s27, 256  ;;  %p3899_p12 = scmp.lt.s32.totalorder %s502_s20, %s3897_s27 }
  0xf1   : > { %p3894_p3 = pnand %p3892_p13, %p4268_p6  ;;  %p3900_p9 = scmp.lt.s32.totalorder %s3898_s11, %s3891_s12 }
  0xf3   : > { %p3895_p0 = pneg %p3894_p3  ;;  %p3901_p2 = por %p3900_p9, %p3899_p12 }
  0xf5   : > { %p3902_p5 = pnand %p3901_p2, %p3895_p0 }
  0xf7   : > { %3905 = shalt.err (!%p3902_p5)
}
  0xf8   : > { %p4740_p7 = scmp.ne.s32.totalorder %s4729_s30, 0  ;;  %p4741_p10 = scmp.ne.s32.totalorder %s4720_s13, 0 }
  0xf9   : > { %s4419_s24 = sand.u32 (!%p4741_p10), 1, %s3992_s22   ;;  %p4742_p6 = scmp.ne.s32.totalorder (!%p4741_p10), %s4717_s29, 0 }
  0xfa   : > { %3406 = dma.hbm_to_vmem [thread:$0]  (!%p4740_p7), %s4393_s16, 128, %s502_s20, %s490_s5  }
  0xfb   : > { %510 = sbr.rel (%p4741_p10) target bundleno = 1629 (0x65d), region = 68  ;;  %s4422_s7 = sshll.u32 (!%p4741_p10), %s4419_s24, 2 }
  0xfc   : > { %s513_s21 = scalar_lea.sflag (!%p4741_p10), [#allocation5], %s4419_s24  ;;  %s516_s28 = scalar_lea.vmem (!%p4741_p10), [#allocation4], %s4422_s7 }
 0x102   : > { %3959 = dma.done.wait (%p4742_p6), %s513_s21, 64  }
 0x103   : > { %3961 = vsyncadd (%p4742_p6), %s513_s21, 4294967232  ;;  %s4743_s30 = sld [smem:[#allocation29_spill]]  ;;  %s525_s16 = scalar_lea.vmem [#allocation7], %s4422_s7 }
 0x109   : > { %s521_s13 = sand.u32 1, %s4743_s30  }
 0x10a   : > { %s522_s9 = scalar_lea.sflag [#allocation8], %s521_s13 }
 0x10b   : > { %3963 = dma.done.wait (%p4742_p6), %s522_s9, 128  }
 0x10c   : > { %3965 = vsyncadd (%p4742_p6), %s522_s9, 4294967168  ;;  %s3076_s15 = sshll.u32 %s4419_s24, 3  ;;  %s534_s20 = scalar_lea.vmem [#allocation9], %s4422_s7 }
 0x10d   : > { %s540_s19 = scalar_lea.sflag [#allocation11], %s521_s13  ;;  %s4440_s5 = scalar_lea.vmem [#allocation10], %s3076_s15 }
 0x10e   : > { %3967 = dma.done.wait (%p4742_p6), %s540_s19, 128  }
 0x10f   : > { %3969 = vsyncadd (%p4742_p6), %s540_s19, 4294967168  ;;  %p4744_p2 = scmp.eq.s32.totalorder %s4743_s30, 0 }
 0x111   : > { %3971 = dma.done.wait (%p4744_p2), [#allocation11], 4096   ;;  %p4745_p11 = pmov %p4744_p2 }
 0x112   : > { %p4746_p8 = pmov %p4744_p2 }
 0x113   : > { %3973 = vsyncadd (%p4745_p11), [#allocation11], 4294963200 }
 0x114   : > { %3975 = dma.done.wait (%p4746_p8), [#allocation14], 8192   ;;  %p4747_p1 = pmov %p4744_p2 }
 0x116   : > { %3977 = vsyncadd (%p4747_p1), [#allocation14], 4294959104  ;;  %p4748_p4 = pmov %p4747_p1 }
 0x117   : > { %p4749_p13 = pmov %p4747_p1 }
 0x118   : > { %3979 = dma.done.wait (%p4748_p4), [#allocation17], 4096  }
 0x119   : > { %3981 = vsyncadd (%p4749_p13), [#allocation17], 4294963200  ;;  %v4022_v0 = vmov 0   ;;  %v3482_v1 = vld [vmem:[#allocation13 + $0x4] ss:$16 sps:$4 sm:$0xff]   ;;  %vm4024_vm0 = vmmov 0  }
 0x11a   : > { %867 = vmatprep.mubr.bf16.mxu0 %v4022_v0  ;;  %908 = vmatprep.mubr.bf16.mxu1 %v4022_v0  ;;  %v3484_v2 = vld [vmem:[#allocation13 + $0xc] ss:$16 sps:$4 sm:$0xff]   ;;  %v3486_v3 = vld [vmem:[#allocation13] ss:$16 sps:$4 sm:$0xff]   ;;  %v3487_v4 = vld [vmem:[#allocation13 + $0x8] ss:$16 sps:$4 sm:$0xff]  }
 0x11b   : > { %835 = vmatprep.subr.bf16.mxu0 %v3482_v1  ;;  %876 = vmatprep.subr.bf16.mxu1 %v3484_v2  ;;  %v3488_v5 = vld [vmem:[#allocation13 + $0x24] ss:$16 sps:$4 sm:$0xff]   ;;  %v3490_v6 = vld [vmem:[#allocation13 + $0x2c] ss:$16 sps:$4 sm:$0xff]   ;;  %v3492_v7 = vld [vmem:[#allocation13 + $0x20] ss:$16 sps:$4 sm:$0xff]  }
 0x11c   : > { %836 = vmatpush1.bf16.msra.mxu0 %v3486_v3  ;;  %877 = vmatpush1.bf16.msra.mxu1 %v3487_v4  ;;  %v3493_v8 = vld [vmem:[#allocation13 + $0x28] ss:$16 sps:$4 sm:$0xff]   ;;  %v3494_v9 = vld [vmem:[#allocation13 + $0x44] ss:$16 sps:$4 sm:$0xff]   ;;  %v3496_v10 = vld [vmem:[#allocation13 + $0x4c] ss:$16 sps:$4 sm:$0xff]  }
 0x11d   : > { %837 = vmatprep.subr.bf16.mxu0 %v3488_v5  ;;  %878 = vmatprep.subr.bf16.mxu1 %v3490_v6  ;;  %v3498_v11 = vld [vmem:[#allocation13 + $0x40] ss:$16 sps:$4 sm:$0xff]   ;;  %v3499_v12 = vld [vmem:[#allocation13 + $0x48] ss:$16 sps:$4 sm:$0xff]   ;;  %v3500_v13 = vld [vmem:[#allocation13 + $0x64] ss:$16 sps:$4 sm:$0xff]  }
 0x11e   : > { %v3502_v14 = vld [vmem:[#allocation13 + $0x6c] ss:$16 sps:$4 sm:$0xff]   ;;  %v3504_v15 = vld [vmem:[#allocation13 + $0x60] ss:$16 sps:$4 sm:$0xff]   ;;  %v3505_v16 = vld [vmem:[#allocation13 + $0x68] ss:$16 sps:$4 sm:$0xff]  }
 0x11f   : > { %v3506_v17 = vld [vmem:[#allocation13 + $0x84] ss:$16 sps:$4 sm:$0xff]   ;;  %v3508_v18 = vld [vmem:[#allocation13 + $0x8c] ss:$16 sps:$4 sm:$0xff]   ;;  %v3510_v19 = vld [vmem:[#allocation13 + $0x80] ss:$16 sps:$4 sm:$0xff]  }
 0x120   : > { %838 = vmatpush1.bf16.msra.mxu0 %v3492_v7  ;;  %879 = vmatpush1.bf16.msra.mxu1 %v3493_v8  ;;  %v3511_v20 = vld [vmem:[#allocation13 + $0x88] ss:$16 sps:$4 sm:$0xff]   ;;  %v3512_v21 = vld [vmem:[#allocation13 + $0xa4] ss:$16 sps:$4 sm:$0xff]   ;;  %v3514_v22 = vld [vmem:[#allocation13 + $0xac] ss:$16 sps:$4 sm:$0xff]  }
 0x121   : > { %839 = vmatprep.subr.bf16.mxu0 %v3494_v9  ;;  %880 = vmatprep.subr.bf16.mxu1 %v3496_v10  ;;  %v3516_v23 = vld [vmem:[#allocation13 + $0xa0] ss:$16 sps:$4 sm:$0xff]   ;;  %v3517_v24 = vld [vmem:[#allocation13 + $0xa8] ss:$16 sps:$4 sm:$0xff]   ;;  %v3518_v25 = vld [vmem:[#allocation13 + $0xc4] ss:$16 sps:$4 sm:$0xff]  }
 0x122   : > { %v3520_v26 = vld [vmem:[#allocation13 + $0xcc] ss:$16 sps:$4 sm:$0xff]   ;;  %v3522_v27 = vld [vmem:[#allocation13 + $0xc0] ss:$16 sps:$4 sm:$0xff]   ;;  %v3523_v28 = vld [vmem:[#allocation13 + $0xc8] ss:$16 sps:$4 sm:$0xff]  }
 0x123   : > { %v3524_v29 = vld [vmem:[#allocation13 + $0xe4] ss:$16 sps:$4 sm:$0xff]   ;;  %v3526_v30 = vld [vmem:[#allocation13 + $0xec] ss:$16 sps:$4 sm:$0xff]   ;;  %v3528_v31 = vld [vmem:[#allocation13 + $0xe0] ss:$16 sps:$4 sm:$0xff]  }
 0x124   : > { %840 = vmatpush1.bf16.msra.mxu0 %v3498_v11  ;;  %881 = vmatpush1.bf16.msra.mxu1 %v3499_v12  ;;  %v3529_v32 = vld [vmem:[#allocation13 + $0xe8] ss:$16 sps:$4 sm:$0xff]   ;;  %v3532_v33 = vld [vmem:[#allocation15 + $0x4] ss:$16 sps:$4 sm:$0xff]   ;;  %v3535_v34 = vld [vmem:[#allocation15 + $0xc] ss:$16 sps:$4 sm:$0xff]  }
 0x125   : > { %841 = vmatprep.subr.bf16.mxu0 %v3500_v13  ;;  %882 = vmatprep.subr.bf16.mxu1 %v3502_v14  ;;  %v620_v35 = vld [vmem:[%s525_s16] sm:$0xf]  ;;  %v3533_v37 = vld [vmem:[#allocation15 + $0x8] ss:$16 sps:$4 sm:$0xff]   ;;  %v3541_v39 = vld [vmem:[#allocation15 + $0x2c] ss:$16 sps:$4 sm:$0xff]  }
 0x126   : > { %v3530_v36 = vld [vmem:[#allocation15] ss:$16 sps:$4 sm:$0xff]   ;;  %v3538_v38 = vld [vmem:[#allocation15 + $0x24] ss:$16 sps:$4 sm:$0xff]   ;;  %v3539_v41 = vld [vmem:[#allocation15 + $0x28] ss:$16 sps:$4 sm:$0xff]  }
 0x127   : > { %v3536_v40 = vld [vmem:[#allocation15 + $0x20] ss:$16 sps:$4 sm:$0xff]   ;;  %v3544_v42 = vld [vmem:[#allocation15 + $0x44] ss:$16 sps:$4 sm:$0xff]   ;;  %v3547_v43 = vld [vmem:[#allocation15 + $0x4c] ss:$16 sps:$4 sm:$0xff]  }
 0x128   : > { %842 = vmatpush1.bf16.msra.mxu0 %v3504_v15  ;;  %883 = vmatpush1.bf16.msra.mxu1 %v3505_v16  ;;  %v3542_v44 = vld [vmem:[#allocation15 + $0x40] ss:$16 sps:$4 sm:$0xff]   ;;  %v3545_v45 = vld [vmem:[#allocation15 + $0x48] ss:$16 sps:$4 sm:$0xff]   ;;  %v3550_v46 = vld [vmem:[#allocation15 + $0x64] ss:$16 sps:$4 sm:$0xff]  }
 0x129   : > { %843 = vmatprep.subr.bf16.mxu0 %v3506_v17  ;;  %884 = vmatprep.subr.bf16.mxu1 %v3508_v18  ;;  %v3553_v47 = vld [vmem:[#allocation15 + $0x6c] ss:$16 sps:$4 sm:$0xff]   ;;  %v3548_v48 = vld [vmem:[#allocation15 + $0x60] ss:$16 sps:$4 sm:$0xff]   ;;  %v3551_v49 = vld [vmem:[#allocation15 + $0x68] ss:$16 sps:$4 sm:$0xff]  }
 0x12a   : > { %v3556_v50 = vld [vmem:[#allocation15 + $0x84] ss:$16 sps:$4 sm:$0xff]   ;;  %v3559_v51 = vld [vmem:[#allocation15 + $0x8c] ss:$16 sps:$4 sm:$0xff]   ;;  %v3554_v52 = vld [vmem:[#allocation15 + $0x80] ss:$16 sps:$4 sm:$0xff]  }
 0x12b   : > { %v3557_v53 = vld [vmem:[#allocation15 + $0x88] ss:$16 sps:$4 sm:$0xff]   ;;  %v3562_v54 = vld [vmem:[#allocation15 + $0xa4] ss:$16 sps:$4 sm:$0xff]   ;;  %v3565_v55 = vld [vmem:[#allocation15 + $0xac] ss:$16 sps:$4 sm:$0xff]  }
 0x12c   : > { %844 = vmatpush1.bf16.msra.mxu0 %v3510_v19  ;;  %885 = vmatpush1.bf16.msra.mxu1 %v3511_v20  ;;  %v3560_v56 = vld [vmem:[#allocation15 + $0xa0] ss:$16 sps:$4 sm:$0xff]   ;;  %v3563_v57 = vld [vmem:[#allocation15 + $0xa8] ss:$16 sps:$4 sm:$0xff]   ;;  %v3568_v58 = vld [vmem:[#allocation15 + $0xc4] ss:$16 sps:$4 sm:$0xff]  }
 0x12d   : > { %845 = vmatprep.subr.bf16.mxu0 %v3512_v21  ;;  %886 = vmatprep.subr.bf16.mxu1 %v3514_v22  ;;  %v3571_v59 = vld [vmem:[#allocation15 + $0xcc] ss:$16 sps:$4 sm:$0xff]   ;;  %v3566_v60 = vld [vmem:[#allocation15 + $0xc0] ss:$16 sps:$4 sm:$0xff]   ;;  %v3569_v61 = vld [vmem:[#allocation15 + $0xc8] ss:$16 sps:$4 sm:$0xff]  }
 0x12e   : > { %v3574_v62 = vld [vmem:[#allocation15 + $0xe4] ss:$16 sps:$4 sm:$0xff]   ;;  %v3577_v63 = vld [vmem:[#allocation15 + $0xec] ss:$16 sps:$4 sm:$0xff]   ;;  %v3572_v1 = vld [vmem:[#allocation15 + $0xe0] ss:$16 sps:$4 sm:$0xff]  }
 0x12f   : > { %v3575_v2 = vld [vmem:[#allocation15 + $0xe8] ss:$16 sps:$4 sm:$0xff]   ;;  %v3580_v3 = vld [vmem:[#allocation12 + $0x4] ss:$16 sps:$4 sm:$0xff]   ;;  %v3583_v4 = vld [vmem:[#allocation12 + $0xc] ss:$16 sps:$4 sm:$0xff]  }
 0x130   : > { %846 = vmatpush1.bf16.msra.mxu0 %v3516_v23  ;;  %887 = vmatpush1.bf16.msra.mxu1 %v3517_v24  ;;  %v917_v5 = vld [vmem:[%s534_s20] sm:$0xf]  ;;  %v3578_v6 = vld [vmem:[#allocation12] ss:$16 sps:$4 sm:$0xff]   ;;  %v3586_v8 = vld [vmem:[#allocation12 + $0x24] ss:$16 sps:$4 sm:$0xff]  }
 0x131   : > { %847 = vmatprep.subr.bf16.mxu0 %v3518_v25  ;;  %888 = vmatprep.subr.bf16.mxu1 %v3520_v26  ;;  %v3581_v7 = vld [vmem:[#allocation12 + $0x8] ss:$16 sps:$4 sm:$0xff]   ;;  %v3589_v9 = vld [vmem:[#allocation12 + $0x2c] ss:$16 sps:$4 sm:$0xff]   ;;  %v3584_v10 = vld [vmem:[#allocation12 + $0x20] ss:$16 sps:$4 sm:$0xff]  }
 0x132   : > { %v3587_v11 = vld [vmem:[#allocation12 + $0x28] ss:$16 sps:$4 sm:$0xff]   ;;  %v3592_v12 = vld [vmem:[#allocation12 + $0x44] ss:$16 sps:$4 sm:$0xff]   ;;  %v3595_v13 = vld [vmem:[#allocation12 + $0x4c] ss:$16 sps:$4 sm:$0xff]  }
 0x133   : > { %v3590_v14 = vld [vmem:[#allocation12 + $0x40] ss:$16 sps:$4 sm:$0xff]   ;;  %v3593_v15 = vld [vmem:[#allocation12 + $0x48] ss:$16 sps:$4 sm:$0xff]   ;;  %v3598_v16 = vld [vmem:[#allocation12 + $0x64] ss:$16 sps:$4 sm:$0xff]  }
 0x134   : > { %848 = vmatpush1.bf16.msra.mxu0 %v3522_v27  ;;  %889 = vmatpush1.bf16.msra.mxu1 %v3523_v28  ;;  %v3601_v17 = vld [vmem:[#allocation12 + $0x6c] ss:$16 sps:$4 sm:$0xff]   ;;  %v3596_v18 = vld [vmem:[#allocation12 + $0x60] ss:$16 sps:$4 sm:$0xff]   ;;  %v3599_v19 = vld [vmem:[#allocation12 + $0x68] ss:$16 sps:$4 sm:$0xff]  }
 0x135   : > { %849 = vmatprep.subr.bf16.mxu0 %v3524_v29  ;;  %890 = vmatprep.subr.bf16.mxu1 %v3526_v30  ;;  %v3604_v20 = vld [vmem:[#allocation12 + $0x84] ss:$16 sps:$4 sm:$0xff]   ;;  %v3607_v21 = vld [vmem:[#allocation12 + $0x8c] ss:$16 sps:$4 sm:$0xff]   ;;  %v3602_v22 = vld [vmem:[#allocation12 + $0x80] ss:$16 sps:$4 sm:$0xff]  }
 0x136   : > { %v3605_v23 = vld [vmem:[#allocation12 + $0x88] ss:$16 sps:$4 sm:$0xff]   ;;  %v3610_v24 = vld [vmem:[#allocation12 + $0xa4] ss:$16 sps:$4 sm:$0xff]   ;;  %v3613_v25 = vld [vmem:[#allocation12 + $0xac] ss:$16 sps:$4 sm:$0xff]  }
 0x137   : > { %v3608_v26 = vld [vmem:[#allocation12 + $0xa0] ss:$16 sps:$4 sm:$0xff]   ;;  %v3611_v27 = vld [vmem:[#allocation12 + $0xa8] ss:$16 sps:$4 sm:$0xff]   ;;  %v3616_v28 = vld [vmem:[#allocation12 + $0xc4] ss:$16 sps:$4 sm:$0xff]  }
 0x138   : > { %850 = vmatpush1.bf16.msra.mxu0 %v3528_v31  ;;  %891 = vmatpush1.bf16.msra.mxu1 %v3529_v32  ;;  %v3619_v29 = vld [vmem:[#allocation12 + $0xcc] ss:$16 sps:$4 sm:$0xff]   ;;  %v3614_v30 = vld [vmem:[#allocation12 + $0xc0] ss:$16 sps:$4 sm:$0xff]   ;;  %v3617_v31 = vld [vmem:[#allocation12 + $0xc8] ss:$16 sps:$4 sm:$0xff]  }
 0x139   : > { %1132 = vmatprep.subr.bf16.mxu0 %v3532_v33  ;;  %1173 = vmatprep.subr.bf16.mxu1 %v3535_v34  ;;  %v3622_v32 = vld [vmem:[#allocation12 + $0xe4] ss:$16 sps:$4 sm:$0xff]   ;;  %v3625_v33 = vld [vmem:[#allocation12 + $0xec] ss:$16 sps:$4 sm:$0xff]   ;;  %v3620_v34 = vld [vmem:[#allocation12 + $0xe0] ss:$16 sps:$4 sm:$0xff]  }
 0x13a   : > { %s4750_s6 = sld [smem:[#allocation38_spill]]  ;;  %s4751_s17 = sld [smem:[#allocation39_spill]]  ;;  %vm2190_vm1 = vcmask 1043456   ;;  %vm2134_vm2 = vcmask 64512  }
 0x13b   : > { %868 = vmatmul.mubr.bf16.vlgmr.msra.gmra.mrb[0].mxu0 %v620_v35  ;;  %909 = vmatmul.mubr.bf16.vlgmr.msra.gmra.mrb[0].mxu1 %v620_v35  ;;  %v3623_v35 = vld [vmem:[#allocation12 + $0xe8] ss:$16 sps:$4 sm:$0xff]   ;;  %s4752_s14 = sld [smem:[#allocation36_spill]]  ;;  %s4753_s27 = sld [smem:[#allocation28_spill]] }
 0x13c   : > { %1133 = vmatpush1.bf16.msra.mxu0 %v3530_v36  ;;  %1174 = vmatpush1.bf16.msra.mxu1 %v3533_v37  ;;  %v1502_v36 = vld [vmem:[%s516_s28] sm:$0xf]  ;;  %v4023_v37 = vmov 0.0   ;;  %s4754_s21 = sld [smem:[#allocation40_spill]]  ;;  %s4755_s28 = sld [smem:[#allocation32_spill]] }
 0x13d   : > { %1134 = vmatprep.subr.bf16.mxu0 %v3538_v38  ;;  %1175 = vmatprep.subr.bf16.mxu1 %v3541_v39  ;;  %v655_v38 = vlaneseq  ;;  %s614_s13 = scalar_lea.vmem [#allocation18], %s3076_s15  ;;  %s4756_s19 = sld [smem:[#allocation41_spill]] }
 0x13e   : > { %1164 = vmatprep.mubr.bf16.mxu0 %v4022_v0  ;;  %1205 = vmatprep.mubr.bf16.mxu1 %v4022_v0  ;;  %s2871_s9 = sshll.u32 %s614_s13, 4  ;;  %s2857_s29 = scalar_lea.sflag [#allocation6], %s4419_s24  ;;  %s4623_s9 = int_to_ptr.vmem [resolvable:$true] %s2871_s9 }
 0x13f   : > { %v656_v39 = vshrl.u32 %v655_v38, 7  ;;  %s3906_s23 = scalar_lea.vmem %s4623_s9, 128  ;;  %s4027_s15 = smov [#allocation18]  }
 0x140   : > { %1135 = vmatpush1.bf16.msra.mxu0 %v3536_v40  ;;  %1176 = vmatpush1.bf16.msra.mxu1 %v3539_v41  ;;  %v4025_v41 = vmov 1983009808   ;;  %p3907_p3 = scmp.ne.s32.totalorder %s4623_s9, %s3906_s23 }
 0x141   : > { %1136 = vmatprep.subr.bf16.mxu0 %v3544_v42  ;;  %1177 = vmatprep.subr.bf16.mxu1 %v3547_v43  ;;  %v4476_v40 = vsub.s32 0, %v656_v39  ;;  %v1217_v42 = vunpack.c.l.s4 %v4025_v41  ;;  %v4478_v43 = vsub.s32 2, %v656_v39  ;;  %s3222_s30 = sshll.u32 %s4753_s27, 7 }
 0x142   : > { %p4757_p0 = scmp.ne.s32.totalorder %s4755_s28, 0 }
 0x144   : > { %1137 = vmatpush1.bf16.msra.mxu0 %v3542_v44  ;;  %1178 = vmatpush1.bf16.msra.mxu1 %v3545_v45  ;;  %v653_v44 = vld [vmem:[%s4750_s6] sm:$0xf]  ;;  %v4483_v45 = vsub.s32 1, %v656_v39  ;;  %p3908_p12 = pnand %p3907_p3, %p4757_p0  ;;  %s3910_s6 = sshll.u32 %s4027_s15, 4  ;;  %s3911_s6 = int_to_ptr.vmem [resolvable:$false] %s3910_s6 }
 0x145   : > { %1138 = vmatprep.subr.bf16.mxu0 %v3550_v46  ;;  %1179 = vmatprep.subr.bf16.mxu1 %v3553_v47  ;;  %v4485_v46 = vsub.s32 3, %v656_v39  ;;  %v658_v47 = vrot.slane %v653_v44, %v4476_v40  ;;  %s3912_s4 = scalar_lea.vmem %s3911_s6, 256  ;;  %p3913_p5 = scmp.lt.s32.totalorder %s4623_s9, %s3911_s6 }
 0x146   : > { %p3909_p9 = pneg %p3908_p12  ;;  %p3914_p7 = scmp.lt.s32.totalorder %s3912_s4, %s3906_s23 }
 0x148   : > { %1139 = vmatpush1.bf16.msra.mxu0 %v3548_v48  ;;  %1180 = vmatpush1.bf16.msra.mxu1 %v3551_v49  ;;  %v1218_v48 = vunpack.c.0.s8 %v1217_v42  ;;  %v666_v49 = vrot.slane %v653_v44, %v4478_v43  ;;  %p3915_p10 = por %p3914_p7, %p3913_p5 }
 0x149   : > { %1140 = vmatprep.subr.bf16.mxu0 %v3556_v50  ;;  %1181 = vmatprep.subr.bf16.mxu1 %v3559_v51  ;;  %v4026_v50 = vmov 1934713408  }
 0x14a   : > { %v1249_v51 = vunpack.c.l.s4 %v4026_v50  ;;  %p3916_p6 = pnand %p3915_p10, %p3909_p9 }
 0x14c   : > { %1141 = vmatpush1.bf16.msra.mxu0 %v3554_v52  ;;  %1182 = vmatpush1.bf16.msra.mxu1 %v3557_v53  ;;  %v662_v52 = vrot.slane %v653_v44, %v4483_v45  ;;  %v670_v53 = vrot.slane %v653_v44, %v4485_v46 }
 0x14d   : > { %1142 = vmatprep.subr.bf16.mxu0 %v3562_v54  ;;  %1183 = vmatprep.subr.bf16.mxu1 %v3565_v55 }
 0x150   : > { %1143 = vmatpush1.bf16.msra.mxu0 %v3560_v56  ;;  %1184 = vmatpush1.bf16.msra.mxu1 %v3563_v57  ;;  %v4491_v57 = vsub.s32 %v1218_v48, %v656_v39 }
 0x151   : > { %1144 = vmatprep.subr.bf16.mxu0 %v3568_v58  ;;  %1185 = vmatprep.subr.bf16.mxu1 %v3571_v59 }
 0x154   : > { %1145 = vmatpush1.bf16.msra.mxu0 %v3566_v60  ;;  %1186 = vmatpush1.bf16.msra.mxu1 %v3569_v61  ;;  %v1250_v61 = vunpack.c.0.s8 %v1249_v51 }
 0x155   : > { %1146 = vmatprep.subr.bf16.mxu0 %v3574_v62  ;;  %1187 = vmatprep.subr.bf16.mxu1 %v3577_v63 }
 0x158   : > { %1147 = vmatpush1.bf16.msra.mxu0 %v3572_v1  ;;  %1188 = vmatpush1.bf16.msra.mxu1 %v3575_v2 }
 0x159   : > { %1717 = vmatprep.subr.bf16.mxu0 %v3580_v3  ;;  %1758 = vmatprep.subr.bf16.mxu1 %v3583_v4 }
 0x15b   : > { %1165 = vmatmul.mubr.bf16.vlgmr.msra.gmra.mrb[4].mxu0 %v917_v5  ;;  %1206 = vmatmul.mubr.bf16.vlgmr.msra.gmra.mrb[4].mxu1 %v917_v5 }
 0x15c   : > { %1718 = vmatpush1.bf16.msra.mxu0 %v3578_v6  ;;  %1759 = vmatpush1.bf16.msra.mxu1 %v3581_v7 }
 0x15d   : > { %1719 = vmatprep.subr.bf16.mxu0 %v3586_v8  ;;  %1760 = vmatprep.subr.bf16.mxu1 %v3589_v9 }
 0x15e   : > { %1749 = vmatprep.mubr.bf16.mxu0 %v4022_v0  ;;  %1790 = vmatprep.mubr.bf16.mxu1 %v4022_v0 }
 0x160   : > { %1720 = vmatpush1.bf16.msra.mxu0 %v3584_v10  ;;  %1761 = vmatpush1.bf16.msra.mxu1 %v3587_v11  ;;  %v4495_v11 = vsub.s32 %v1250_v61, %v656_v39 }
 0x161   : > { %1721 = vmatprep.subr.bf16.mxu0 %v3592_v12  ;;  %1762 = vmatprep.subr.bf16.mxu1 %v3595_v13 }
 0x164   : > { %1722 = vmatpush1.bf16.msra.mxu0 %v3590_v14  ;;  %1763 = vmatpush1.bf16.msra.mxu1 %v3593_v15 }
 0x165   : > { %1723 = vmatprep.subr.bf16.mxu0 %v3598_v16  ;;  %1764 = vmatprep.subr.bf16.mxu1 %v3601_v17 }
 0x168   : > { %1724 = vmatpush1.bf16.msra.mxu0 %v3596_v18  ;;  %1765 = vmatpush1.bf16.msra.mxu1 %v3599_v19 }
 0x169   : > { %1725 = vmatprep.subr.bf16.mxu0 %v3604_v20  ;;  %1766 = vmatprep.subr.bf16.mxu1 %v3607_v21 }
 0x16c   : > { %1726 = vmatpush1.bf16.msra.mxu0 %v3602_v22  ;;  %1767 = vmatpush1.bf16.msra.mxu1 %v3605_v23 }
 0x16d   : > { %1727 = vmatprep.subr.bf16.mxu0 %v3610_v24  ;;  %1768 = vmatprep.subr.bf16.mxu1 %v3613_v25 }
 0x170   : > { %1728 = vmatpush1.bf16.msra.mxu0 %v3608_v26  ;;  %1769 = vmatpush1.bf16.msra.mxu1 %v3611_v27 }
 0x171   : > { %1729 = vmatprep.subr.bf16.mxu0 %v3616_v28  ;;  %1770 = vmatprep.subr.bf16.mxu1 %v3619_v29 }
 0x174   : > { %1730 = vmatpush1.bf16.msra.mxu0 %v3614_v30  ;;  %1771 = vmatpush1.bf16.msra.mxu1 %v3617_v31 }
 0x175   : > { %1731 = vmatprep.subr.bf16.mxu0 %v3622_v32  ;;  %1772 = vmatprep.subr.bf16.mxu1 %v3625_v33 }
 0x178   : > { %1732 = vmatpush1.bf16.msra.mxu0 %v3620_v34  ;;  %1773 = vmatpush1.bf16.msra.mxu1 %v3623_v35 }
 0x179   : > { %3307 = vmatprep.subr.bf16.mxu0 %v4023_v37  ;;  %3313 = vmatprep.subr.bf16.mxu1 %v4023_v37 }
 0x17b   : > { %1750 = vmatmul.mubr.bf16.vlgmr.msra.gmra.mrb[8].mxu0 %v1502_v36  ;;  %1791 = vmatmul.mubr.bf16.vlgmr.msra.gmra.mrb[8].mxu1 %v1502_v36 }
 0x17c   : > { %3309 = vmatprep.mubr.msk.bf16.mxu0 %vm4024_vm0, %v4023_v37  ;;  %3315 = vmatprep.mubr.msk.bf16.mxu1 %vm4024_vm0, %v4023_v37 }
 0x20e   : > { %v869_v54 = vpop.f32.mrb[0].mxu0  ;;  %v910_v55 = vpop.f32.mrb[0].mxu1 }
 0x20f   : > { %v870_v56 = vadd.f32 %v869_v54, %v658_v47  ;;  %v911_v58 = vadd.f32 %v910_v55, %v666_v49  ;;  %v871_v59 = vpop.f32.mrb[1].mxu0  ;;  %v912_v60 = vpop.f32.mrb[1].mxu1  ;;  %v950_v49 = vld [vmem:[%s4751_s17] sm:$0xf] }
 0x210   : > { %v872_v62 = vadd.f32 %v871_v59, %v662_v52  ;;  %v913_v63 = vadd.f32 %v912_v60, %v670_v53  ;;  %v873_v1 = vpop.f32.mrb[2].mxu0  ;;  %v914_v2 = vpop.f32.mrb[2].mxu1  ;;  %v955_v50 = vrot.slane %v950_v49, %v4476_v40  ;;  %v963_v51 = vrot.slane %v950_v49, %v4478_v43 }
 0x211   : > { %v1214_v3 = vcombine.low %v870_v56, %v911_v58  ;;  %v1215_v4 = vcombine.high %v870_v56, %v911_v58  ;;  %v874_v5 = vpop.f32.mrb[3].mxu0  ;;  %v915_v6 = vpop.f32.mrb[3].mxu1  ;;  %v959_v52 = vrot.slane %v950_v49, %v4483_v45  ;;  %v967_v53 = vrot.slane %v950_v49, %v4485_v46 }
 0x212   : > { %v1230_v7 = vcombine.low %v872_v62, %v913_v63  ;;  %v1231_v8 = vcombine.high %v872_v62, %v913_v63 }
 0x213   : > { %v1222_v9 = vrot.slane %v1214_v3, %v4491_v57  ;;  %v1229_v10 = vrot.slane %v1215_v4, %v4491_v57 }
 0x214   : > { %v1238_v12 = vrot.slane %v1230_v7, %v4491_v57  ;;  %v1245_v13 = vrot.slane %v1231_v8, %v4491_v57 }
 0x216   : > { %v1246_v14 = vcombine.low %v1222_v9, %v1238_v12  ;;  %v1247_v15 = vcombine.high %v1222_v9, %v1238_v12  ;;  %v1262_v16 = vcombine.low %v1229_v10, %v1245_v13  ;;  %v1263_v17 = vcombine.high %v1229_v10, %v1245_v13 }
 0x218   : > { %v1254_v18 = vrot.slane %v1246_v14, %v4495_v11  ;;  %v1261_v19 = vrot.slane %v1247_v15, %v4495_v11  ;;  %v1270_v20 = vrot.slane %v1262_v16, %v4495_v11  ;;  %v1277_v21 = vrot.slane %v1263_v17, %v4495_v11 }
 0x21a   : > { %v1282_v22 = vcombine.low %v1254_v18, %v1261_v19  ;;  %v3146_v23 = vcombine.high %v1254_v18, %v1261_v19  ;;  %v1298_v24 = vcombine.low %v1270_v20, %v1277_v21  ;;  %v3147_v25 = vcombine.high %v1270_v20, %v1277_v21 }
 0x21c   : > { %v1289_v26 = vrot.slane %v1282_v22, %v4491_v57  ;;  %v1297_v27 = vrot.slane %v3146_v23, %v4491_v57  ;;  %v1305_v28 = vrot.slane %v1298_v24, %v4491_v57  ;;  %v1313_v29 = vrot.slane %v3147_v25, %v4491_v57 }
 0x21e   : > { %v1314_v30 = vcombine.low %v1289_v26, %v1297_v27  ;;  %v1315_v31 = vcombine.high %v1289_v26, %v1297_v27  ;;  %v1330_v32 = vcombine.low %v1305_v28, %v1313_v29  ;;  %v1331_v33 = vcombine.high %v1305_v28, %v1313_v29 }
 0x220   : > { %v1322_v34 = vrot.slane %v1314_v30, %v4495_v11  ;;  %v1329_v35 = vrot.slane %v1315_v31, %v4495_v11  ;;  %v1338_v36 = vrot.slane %v1330_v32, %v4495_v11  ;;  %v1345_v38 = vrot.slane %v1331_v33, %v4495_v11 }
 0x222   : > { %v1346_v39 = vcombine.low %v1322_v34, %v1338_v36  ;;  %v1347_v41 = vcombine.high %v1322_v34, %v1338_v36  ;;  %v1348_v42 = vcombine.low %v1329_v35, %v1345_v38  ;;  %v1349_v44 = vcombine.high %v1329_v35, %v1345_v38 }
 0x224   : > { %v3228_v47 = vpack.c.bf16 %v1347_v41, %v1346_v39  ;;  %v3233_v48 = vpack.c.bf16 %v1349_v44, %v1348_v42 }
 0x226   : > { %3229 = vst [vmem:[#allocation2] sm:$0xff] %v3228_v47   ;;  %3245 = vst [vmem:[#allocation2 + $0x8] sm:$0xff] %v3233_v48  }
 0x22d   : > { %v1969_v54 = vld [vmem:[#allocation2] sm:$0xf]  ;;  %v1970_v55 = vld [vmem:[#allocation2 + $0x4] sm:$0xf] }
 0x22e   : > { %v1166_v56 = vpop.f32.mrb[4].mxu0  ;;  %v1207_v58 = vpop.f32.mrb[4].mxu1  ;;  %3308 = vmatpush3.bf16.xpose.msra.mxu0 %v1969_v54  ;;  %3314 = vmatpush3.bf16.xpose.msra.mxu1 %v1970_v55 }
 0x22f   : > { %v1167_v59 = vadd.f32 %v1166_v56, %v955_v50  ;;  %v1208_v60 = vadd.f32 %v1207_v58, %v963_v51  ;;  %v1168_v61 = vpop.f32.mrb[5].mxu0  ;;  %v1209_v62 = vpop.f32.mrb[5].mxu1  ;;  %3319 = vmatprep.subr.bf16.mxu0 %v4023_v37  ;;  %3325 = vmatprep.subr.bf16.mxu1 %v4023_v37  ;;  %v1535_v50 = vld [vmem:[%s4752_s14] sm:$0xf] }
 0x230   : > { %v1169_v63 = vadd.f32 %v1168_v61, %v959_v52  ;;  %v1210_v1 = vadd.f32 %v1209_v62, %v967_v53  ;;  %v1170_v2 = vpop.f32.mrb[6].mxu0  ;;  %v1211_v3 = vpop.f32.mrb[6].mxu1  ;;  %v1540_v51 = vrot.slane %v1535_v50, %v4476_v40  ;;  %v1548_v52 = vrot.slane %v1535_v50, %v4478_v43 }
 0x231   : > { %v1358_v4 = vcombine.low %v1167_v59, %v1208_v60  ;;  %v1359_v5 = vcombine.high %v1167_v59, %v1208_v60  ;;  %v1171_v6 = vpop.f32.mrb[7].mxu0  ;;  %v1212_v7 = vpop.f32.mrb[7].mxu1  ;;  %v1544_v53 = vrot.slane %v1535_v50, %v4483_v45  ;;  %v1552_v54 = vrot.slane %v1535_v50, %v4485_v46 }
 0x232   : > { %v1374_v8 = vcombine.low %v1169_v63, %v1210_v1  ;;  %v1375_v9 = vcombine.high %v1169_v63, %v1210_v1 }
 0x233   : > { %v1366_v10 = vrot.slane %v1358_v4, %v4491_v57  ;;  %v1373_v12 = vrot.slane %v1359_v5, %v4491_v57 }
 0x234   : > { %v1382_v13 = vrot.slane %v1374_v8, %v4491_v57  ;;  %v1389_v14 = vrot.slane %v1375_v9, %v4491_v57 }
 0x236   : > { %v1390_v15 = vcombine.low %v1366_v10, %v1382_v13  ;;  %v1391_v16 = vcombine.high %v1366_v10, %v1382_v13  ;;  %v1406_v17 = vcombine.low %v1373_v12, %v1389_v14  ;;  %v1407_v18 = vcombine.high %v1373_v12, %v1389_v14 }
 0x238   : > { %v1398_v19 = vrot.slane %v1390_v15, %v4495_v11  ;;  %v1405_v20 = vrot.slane %v1391_v16, %v4495_v11  ;;  %v1414_v21 = vrot.slane %v1406_v17, %v4495_v11  ;;  %v1421_v22 = vrot.slane %v1407_v18, %v4495_v11 }
 0x23a   : > { %v1426_v23 = vcombine.low %v1398_v19, %v1405_v20  ;;  %v3148_v24 = vcombine.high %v1398_v19, %v1405_v20  ;;  %v1442_v25 = vcombine.low %v1414_v21, %v1421_v22  ;;  %v3149_v26 = vcombine.high %v1414_v21, %v1421_v22 }
 0x23c   : > { %v1433_v27 = vrot.slane %v1426_v23, %v4491_v57  ;;  %v1441_v28 = vrot.slane %v3148_v24, %v4491_v57  ;;  %v1449_v29 = vrot.slane %v1442_v25, %v4491_v57  ;;  %v1457_v30 = vrot.slane %v3149_v26, %v4491_v57 }
 0x23e   : > { %v1458_v31 = vcombine.low %v1433_v27, %v1441_v28  ;;  %v1459_v32 = vcombine.high %v1433_v27, %v1441_v28  ;;  %v1474_v33 = vcombine.low %v1449_v29, %v1457_v30  ;;  %v1475_v34 = vcombine.high %v1449_v29, %v1457_v30 }
 0x240   : > { %v1466_v35 = vrot.slane %v1458_v31, %v4495_v11  ;;  %v1473_v36 = vrot.slane %v1459_v32, %v4495_v11  ;;  %v1482_v38 = vrot.slane %v1474_v33, %v4495_v11  ;;  %v1489_v39 = vrot.slane %v1475_v34, %v4495_v11 }
 0x242   : > { %v1490_v41 = vcombine.low %v1466_v35, %v1482_v38  ;;  %v1491_v42 = vcombine.high %v1466_v35, %v1482_v38  ;;  %v1492_v44 = vcombine.low %v1473_v36, %v1489_v39  ;;  %v1493_v47 = vcombine.high %v1473_v36, %v1489_v39 }
 0x244   : > { %v3238_v48 = vpack.c.bf16 %v1491_v42, %v1490_v41  ;;  %v3243_v49 = vpack.c.bf16 %v1493_v47, %v1492_v44 }
 0x246   : > { %3239 = vst [vmem:[#allocation3] sm:$0xff] %v3238_v48   ;;  %3246 = vst [vmem:[#allocation3 + $0x8] sm:$0xff] %v3243_v49  }
 0x24e   : > { %v1751_v55 = vpop.f32.mrb[8].mxu0  ;;  %v1792_v56 = vpop.f32.mrb[8].mxu1 }
 0x24f   : > { %v1752_v58 = vadd.f32 %v1751_v55, %v1540_v51  ;;  %v1793_v59 = vadd.f32 %v1792_v56, %v1548_v52  ;;  %v1753_v60 = vpop.f32.mrb[9].mxu0  ;;  %v1794_v61 = vpop.f32.mrb[9].mxu1 }
 0x250   : > { %v1754_v62 = vadd.f32 %v1753_v60, %v1544_v53  ;;  %v1795_v63 = vadd.f32 %v1794_v61, %v1552_v54  ;;  %v1755_v1 = vpop.f32.mrb[10].mxu0  ;;  %v1796_v2 = vpop.f32.mrb[10].mxu1 }
 0x251   : > { %v1799_v3 = vmul.f32 0.35355338, %v1752_v58  ;;  %v1801_v4 = vmul.f32 0.35355338, %v1793_v59  ;;  %v1756_v5 = vpop.f32.mrb[11].mxu0  ;;  %v1797_v40 = vpop.f32.mrb[11].mxu1 }
 0x252   : > { %v1800_v6 = vmul.f32 0.35355338, %v1754_v62  ;;  %v1802_v43 = vmul.f32 0.35355338, %v1795_v63  ;;  %v1971_v2 = vld [vmem:[#allocation2 + $0x8] sm:$0xf] }
 0x253   : > { %v1803_v7 = vpack.c.bf16 %v1799_v3, %v1799_v3  ;;  %v1811_v45 = vpack.c.bf16 %v1801_v4, %v1801_v4 }
 0x254   : > { %v1837_v8 = vpack.c.bf16 %v1800_v6, %v1800_v6  ;;  %v1845_v46 = vpack.c.bf16 %v1802_v43, %v1802_v43  ;;  %v1972_v6 = vld [vmem:[#allocation2 + $0xc] sm:$0xf] }
 0x255   : > { %v1810_v9 = vrot.slane %v1803_v7, %v4491_v57  ;;  %v1818_v10 = vrot.slane %v1811_v45, %v4491_v57  ;;  %v2184_v7 = vld [vmem:[#allocation3 + $0x4] sm:$0xf] }
 0x256   : > { %v1844_v12 = vrot.slane %v1837_v8, %v4491_v57  ;;  %v1852_v13 = vrot.slane %v1845_v46, %v4491_v57  ;;  %v2238_v8 = vsel %vm2190_vm1, %v2184_v7, 0  ;;  %v1973_v46 = vld [vmem:[%s4440_s5] sm:$0xff]  ;;  %s4621_s5 = scalar_lea.hbm %s4756_s19, %s3222_s30 }
 0x257   : > { %v1819_v14 = vcombine.low %v1810_v9, %v1818_v10  ;;  %v1820_v15 = vcombine.high %v1810_v9, %v1818_v10 }
 0x258   : > { %v1853_v16 = vcombine.low %v1844_v12, %v1852_v13  ;;  %v1854_v17 = vcombine.high %v1844_v12, %v1852_v13 }
 0x259   : > { %v1827_v18 = vrot.slane %v1819_v14, %v4495_v11  ;;  %v1834_v19 = vrot.slane %v1820_v15, %v4495_v11 }
 0x25a   : > { %v1861_v20 = vrot.slane %v1853_v16, %v4495_v11  ;;  %v1868_v21 = vrot.slane %v1854_v17, %v4495_v11 }
 0x25b   : > { %v1835_v22 = vcombine.high %v1827_v18, %v4022_v0  ;;  %v1836_v23 = vcombine.high %v1834_v19, %v4022_v0  ;;  %v1875_v24 = vshrl.u32 %v1827_v18, 16  ;;  %v1891_v25 = vshrl.u32 %v1834_v19, 16 }
 0x25c   : > { %v1869_v26 = vcombine.high %v1861_v20, %v4022_v0  ;;  %v1870_v27 = vcombine.high %v1868_v21, %v4022_v0  ;;  %v1873_v28 = vpack.i.b16 %v1861_v20, %v1827_v18  ;;  %v1876_v29 = vshrl.u32 %v1861_v20, 16 }
 0x25d   : > { %v1883_v30 = vshrl.u32 %v1835_v22, 16  ;;  %v1899_v31 = vshrl.u32 %v1836_v23, 16  ;;  %v1889_v32 = vpack.i.b16 %v1868_v21, %v1834_v19  ;;  %v1892_v33 = vshrl.u32 %v1868_v21, 16 }
 0x25e   : > { %v1877_v34 = vpack.i.b16 %v1876_v29, %v1875_v24  ;;  %v1881_v35 = vpack.i.b16 %v1869_v26, %v1835_v22  ;;  %v1884_v36 = vshrl.u32 %v1869_v26, 16  ;;  %v1897_v38 = vpack.i.b16 %v1870_v27, %v1836_v23 }
 0x25f   : > { %v1893_v39 = vpack.i.b16 %v1892_v33, %v1891_v25  ;;  %v1900_v41 = vshrl.u32 %v1870_v27, 16  ;;  %v1903_v42 = vcombine.low %v1873_v28, %v1889_v32 }
 0x260   : > { %v1885_v44 = vpack.i.b16 %v1884_v36, %v1883_v30  ;;  %v1911_v47 = vcombine.low %v1881_v35, %v1897_v38 }
 0x261   : > { %v1901_v48 = vpack.i.b16 %v1900_v41, %v1899_v31  ;;  %v1928_v49 = vcombine.low %v1877_v34, %v1893_v39  ;;  %v1910_v50 = vrot.slane %v1903_v42, %v4491_v57 }
 0x262   : > { %v1918_v51 = vrot.slane %v1911_v47, %v4491_v57 }
 0x263   : > { %v1936_v52 = vcombine.low %v1885_v44, %v1901_v48  ;;  %v1935_v54 = vrot.slane %v1928_v49, %v4491_v57 }
 0x264   : > { %v1919_v53 = vcombine.low %v1910_v50, %v1918_v51 }
 0x265   : > { %v1943_v55 = vrot.slane %v1936_v52, %v4491_v57 }
 0x266   : > { %v1926_v56 = vrot.slane %v1919_v53, %v4495_v11 }
 0x267   : > { %v1944_v58 = vcombine.low %v1935_v54, %v1943_v55 }
 0x268   : > { %v1927_v60 = vcombine.high %v1926_v56, %v4022_v0  ;;  %v1957_v62 = vshrl.u32 %v1926_v56, 16 }
 0x269   : > { %v1951_v59 = vrot.slane %v1944_v58, %v4495_v11 }
 0x26a   : > { %v1965_v5 = vshrl.u32 %v1927_v60, 16 }
 0x26b   : > { %v1955_v61 = vpack.i.b16 %v1951_v59, %v1926_v56  ;;  %v1958_v63 = vshrl.u32 %v1951_v59, 16  ;;  %v1952_v1 = vcombine.high %v1951_v59, %v4022_v0  ;;  %v2183_v0 = vld [vmem:[#allocation3] sm:$0xf] }
 0x26c   : > { %v2192_v45 = vsel %vm2190_vm1, %v2183_v0, 0 }
 0x26d   : > { %3310 = vmatmul.mubr.bf16.vlgmr.msra.gmra.mrb[12].mxu0 %v1955_v61  ;;  %v1959_v3 = vpack.i.b16 %v1958_v63, %v1957_v62  ;;  %v1963_v4 = vpack.i.b16 %v1952_v1, %v1927_v60  ;;  %v1966_v40 = vshrl.u32 %v1952_v1, 16 }
 0x26e   : > { %3320 = vmatpush3.bf16.xpose.msra.mxu0 %v1971_v2  ;;  %3321 = vmatprep.mubr.msk.bf16.mxu0 %vm4024_vm0, %v4023_v37 }
 0x26f   : > { %3316 = vmatmul.mubr.bf16.vlgmr.msra.gmra.mrb[12].mxu1 %v1959_v3  ;;  %3331 = vmatprep.subr.bf16.mxu0 %v4023_v37  ;;  %v1967_v43 = vpack.i.b16 %v1966_v40, %v1965_v5  ;;  %v2185_v3 = vld [vmem:[#allocation3 + $0x8] sm:$0xf] }
 0x270   : > { %3326 = vmatpush3.bf16.xpose.msra.mxu1 %v1972_v6  ;;  %3327 = vmatprep.mubr.msk.bf16.mxu1 %vm4024_vm0, %v4023_v37  ;;  %v2284_v6 = vsel %vm2190_vm1, %v2185_v3, 0 }
 0x271   : > { %3337 = vmatprep.subr.bf16.mxu1 %v4023_v37 }
 0x275   : > { %3322 = vmatmul.mubr.bf16.vlgmr.msra.gmra.mrb[16].mxu0 %v1963_v4 }
 0x276   : > { %3332 = vmatpush3.bf16.msra.mxu0 %v2192_v45  ;;  %3333 = vmatprep.mubr.msk.bf16.mxu0 %vm4024_vm0, %v4023_v37 }
 0x277   : > { %3328 = vmatmul.mubr.bf16.vlgmr.msra.gmra.mrb[16].mxu1 %v1967_v43  ;;  %3343 = vmatprep.subr.bf16.mxu0 %v4023_v37  ;;  %v2186_v43 = vld [vmem:[#allocation3 + $0xc] sm:$0xf] }
 0x278   : > { %3338 = vmatpush3.bf16.msra.mxu1 %v2238_v8  ;;  %3339 = vmatprep.mubr.msk.bf16.mxu1 %vm4024_vm0, %v4023_v37  ;;  %v2330_v8 = vsel %vm2190_vm1, %v2186_v43, 0 }
 0x279   : > { %3349 = vmatprep.subr.bf16.mxu1 %v4023_v37 }
 0x340   : > { %v2008_v9 = vpop.f32.mrb[12].mxu0 }
 0x341   : > { %v2009_v10 = vadd.f32 %v2008_v9, %v1973_v46  ;;  %v3311_v12 = vpop.f32.mrb[13].mxu0 }
 0x342   : > { %v2011_v13 = vpop.f32.mrb[14].mxu0  ;;  %v2048_v14 = vpop.f32.mrb[12].mxu1 }
 0x343   : > { %v2049_v15 = vadd.f32 %v2048_v14, %v1973_v46  ;;  %v3312_v16 = vpop.f32.mrb[15].mxu0  ;;  %v3317_v17 = vpop.f32.mrb[13].mxu1  ;;  %v2135_v18 = vsel %vm2134_vm2, %v2009_v10, -inf  ;;  %v3626_v13 = vld [vmem:[#allocation16 + $0x40] sm:$0xff]  }
 0x344   : > { %v2051_v19 = vpop.f32.mrb[14].mxu1  ;;  %2136 = vmax.xlane.f32.xlu0 %v2135_v18  ;;  %v3627_v14 = vld [vmem:[#allocation16 + $0xc0] sm:$0xff]   ;;  %v3630_v17 = vld [vmem:[#allocation16 + $0x48] sm:$0xff]  }
 0x345   : > { %v3318_v20 = vpop.f32.mrb[15].mxu1  ;;  %v2138_v21 = vsel %vm2134_vm2, %v2049_v15, -inf  ;;  %v3629_v16 = vld [vmem:[#allocation16 + $0x80] sm:$0xff]   ;;  %v3631_v18 = vld [vmem:[#allocation16 + $0xc8] sm:$0xff]  }
 0x346   : > { %v3632_v19 = vld [vmem:[#allocation16 + $0x8] sm:$0xff]   ;;  %v3634_v20 = vld [vmem:[#allocation16 + $0x50] sm:$0xff]  }
 0x348   : > { %2139 = vmax.xlane.f32.xlu0 %v2138_v21  ;;  %v2088_v22 = vpop.f32.mrb[16].mxu0  ;;  %v3635_v21 = vld [vmem:[#allocation16 + $0xd0] sm:$0xff]  }
 0x349   : > { %v2089_v23 = vadd.f32 %v2088_v22, %v1973_v46  ;;  %v3323_v24 = vpop.f32.mrb[17].mxu0  ;;  %v3636_v22 = vld [vmem:[#allocation16 + $0x10] sm:$0xff]  }
 0x34a   : > { %v2091_v25 = vpop.f32.mrb[18].mxu0  ;;  %v2128_v26 = vpop.f32.mrb[16].mxu1  ;;  %v3638_v24 = vld [vmem:[#allocation16 + $0x58] sm:$0xff]  }
 0x34b   : > { %v2129_v27 = vadd.f32 %v2128_v26, %v1973_v46  ;;  %v3324_v28 = vpop.f32.mrb[19].mxu0  ;;  %v3329_v29 = vpop.f32.mrb[17].mxu1  ;;  %v2141_v30 = vsel %vm2134_vm2, %v2089_v23, -inf  ;;  %v3639_v25 = vld [vmem:[#allocation16 + $0xd8] sm:$0xff]  }
 0x34c   : > { %v2131_v31 = vpop.f32.mrb[18].mxu1  ;;  %2142 = vmax.xlane.f32.xlu1 %v2141_v30  ;;  %v3640_v26 = vld [vmem:[#allocation16 + $0x18] sm:$0xff]   ;;  %v3642_v28 = vld [vmem:[#allocation16 + $0x60] sm:$0xff]  }
 0x34d   : > { %v3330_v32 = vpop.f32.mrb[19].mxu1  ;;  %v2144_v33 = vsel %vm2134_vm2, %v2129_v27, -inf  ;;  %v3643_v29 = vld [vmem:[#allocation16 + $0xe0] sm:$0xff]  }
 0x34e   : > { %v3644_v30 = vld [vmem:[#allocation16 + $0x20] sm:$0xff]   ;;  %v3646_v32 = vld [vmem:[#allocation16 + $0x68] sm:$0xff]  }
 0x34f   : > { %v3645_v31 = vld [vmem:[#allocation16 + $0xa0] sm:$0xff]  }
 0x350   : > { %2145 = vmax.xlane.f32.xlu1 %v2144_v33  ;;  %v3647_v33 = vld [vmem:[#allocation16 + $0xe8] sm:$0xff]  }
 0x3d1   : > { %v2137_v34 = vpop.xlane.xlu0 %2136 }
 0x3d2   : > { %v2147_v35 = vsub.f32 %v2009_v10, %v2137_v34  ;;  %v3648_v34 = vld [vmem:[#allocation16 + $0x28] sm:$0xff]  }
 0x3d4   : > { %v2151_v36 = vmul.f32 1.442695, %v2147_v35  ;;  %v3649_v35 = vld [vmem:[#allocation16 + $0xa8] sm:$0xff]  }
 0x3d5   : > { %v2140_v38 = vpop.xlane.xlu0 %2139 }
 0x3d6   : > { %3658 = vpow2.f32 %v2151_v36  ;;  %v2148_v39 = vsub.f32 %v2049_v15, %v2140_v38  ;;  %v3628_v15 = vld [vmem:[#allocation16] sm:$0xff]   ;;  %v3650_v36 = vld [vmem:[#allocation16 + $0x70] sm:$0xff]  }
 0x3d7   : > { %v3651_v38 = vld [vmem:[#allocation16 + $0xf0] sm:$0xff]  }
 0x3d8   : > { %v2153_v41 = vmul.f32 1.442695, %v2148_v39  ;;  %v3652_v39 = vld [vmem:[#allocation16 + $0x30] sm:$0xff]  }
 0x3d9   : > { %v2143_v42 = vpop.xlane.xlu1 %2142 }
 0x3da   : > { %3660 = vpow2.f32 %v2153_v41  ;;  %v2149_v44 = vsub.f32 %v2089_v23, %v2143_v42  ;;  %v3637_v23 = vld [vmem:[#allocation16 + $0x90] sm:$0xff]   ;;  %v3654_v42 = vld [vmem:[#allocation16 + $0x78] sm:$0xff]  }
 0x3db   : > { %v3653_v41 = vld [vmem:[#allocation16 + $0xb0] sm:$0xff]  }
 0x3dc   : > { %v2155_v47 = vmul.f32 1.442695, %v2149_v44  ;;  %v3655_v44 = vld [vmem:[#allocation16 + $0xf8] sm:$0xff]  }
 0x3dd   : > { %v2146_v48 = vpop.xlane.xlu1 %2145 }
 0x3de   : > { %3662 = vpow2.f32 %v2155_v47  ;;  %v2150_v49 = vsub.f32 %v2129_v27, %v2146_v48  ;;  %v3641_v27 = vld [vmem:[#allocation16 + $0x98] sm:$0xff]  }
 0x3df   : > { %v3656_v47 = vld [vmem:[#allocation16 + $0x38] sm:$0xff]  }
 0x3e0   : > { %v3659_v50 = vpop.eup %3658  ;;  %v2157_v51 = vmul.f32 1.442695, %v2150_v49  ;;  %v3657_v48 = vld [vmem:[#allocation16 + $0xb8] sm:$0xff]  }
 0x3e1   : > { %v2159_v52 = vsel %vm2134_vm2, %v3659_v50, 0.0 }
 0x3e2   : > { %3664 = vpow2.f32 %v2157_v51  ;;  %2160 = vadd.xlane.f32.xlu0 %v2159_v52 }
 0x3e4   : > { %v3661_v53 = vpop.eup %3660 }
 0x3e5   : > { %v2162_v54 = vsel %vm2134_vm2, %v3661_v53, 0.0 }
 0x3e6   : > { %2163 = vadd.xlane.f32.xlu1 %v2162_v54 }
 0x3e8   : > { %v3663_v55 = vpop.eup %3662 }
 0x3e9   : > { %v2165_v56 = vsel %vm2134_vm2, %v3663_v55, 0.0 }
 0x3ea   : > { %2166 = vadd.xlane.f32.xlu0 %v2165_v56 }
 0x3ec   : > { %v3665_v58 = vpop.eup %3664 }
 0x3ed   : > { %v2168_v59 = vsel %vm2134_vm2, %v3665_v58, 0.0 }
 0x3ee   : > { %2169 = vadd.xlane.f32.xlu1 %v2168_v59 }
 0x46f   : > { %v2161_v60 = vpop.xlane.xlu0 %2160 }
 0x470   : > { %3666 = vrcp.f32 %v2161_v60 }
 0x473   : > { %v2164_v61 = vpop.xlane.xlu1 %2163 }
 0x474   : > { %3668 = vrcp.f32 %v2164_v61 }
 0x477   : > { %v2167_v62 = vpop.xlane.xlu0 %2166 }
 0x478   : > { %3670 = vrcp.f32 %v2167_v62 }
 0x47a   : > { %v3667_v63 = vpop.eup %3666 }
 0x47b   : > { %v2175_v1 = vmul.f32 %v3667_v63, %v3659_v50  ;;  %v2170_v2 = vpop.xlane.xlu1 %2169 }
 0x47c   : > { %3672 = vrcp.f32 %v2170_v2 }
 0x47d   : > { %v2179_v4 = vpack.c.bf16 %v2175_v1, %v2175_v1 }
 0x47e   : > { %v3669_v5 = vpop.eup %3668 }
 0x47f   : > { %v2176_v40 = vmul.f32 %v3669_v5, %v3661_v53  ;;  %3334 = vmatmul.mubr.msk.bf16.vlgmr.msra.gmra.mrb[20].mxu0 %vm2134_vm2, %v2179_v4 }
 0x480   : > { %3344 = vmatpush3.bf16.msra.mxu0 %v2284_v6  ;;  %3345 = vmatprep.mubr.msk.bf16.mxu0 %vm4024_vm0, %v4023_v37 }
 0x481   : > { %v2180_v0 = vpack.c.bf16 %v2176_v40, %v2176_v40  ;;  %3263 = vmatprep.subr.bf16.mxu0 %v3626_v13 }
 0x482   : > { %v3671_v7 = vpop.eup %3670 }
 0x483   : > { %v2177_v45 = vmul.f32 %v3671_v7, %v3663_v55  ;;  %3340 = vmatmul.mubr.msk.bf16.vlgmr.msra.gmra.mrb[20].mxu1 %vm2134_vm2, %v2180_v0 }
 0x484   : > { %3350 = vmatpush3.bf16.msra.mxu1 %v2330_v8  ;;  %3351 = vmatprep.mubr.msk.bf16.mxu1 %vm4024_vm0, %v4023_v37  ;;  %v3633_v37 = vld [vmem:[#allocation16 + $0x88] sm:$0xff]  }
 0x485   : > { %v2181_v46 = vpack.c.bf16 %v2177_v45, %v2177_v45  ;;  %3285 = vmatprep.subr.bf16.mxu1 %v3627_v14 }
 0x486   : > { %v3673_v9 = vpop.eup %3672 }
 0x487   : > { %v2178_v10 = vmul.f32 %v3673_v9, %v3665_v58  ;;  %3346 = vmatmul.mubr.msk.bf16.vlgmr.msra.gmra.mrb[24].mxu0 %vm2134_vm2, %v2181_v46 }
 0x488   : > { %3264 = vmatpush3.bf16.msra.mxu0 %v3628_v15 }
 0x489   : > { %v2182_v12 = vpack.c.bf16 %v2178_v10, %v2178_v10  ;;  %3265 = vmatprep.subr.bf16.mxu0 %v3630_v17 }
 0x48b   : > { %3352 = vmatmul.mubr.msk.bf16.vlgmr.msra.gmra.mrb[24].mxu1 %vm2134_vm2, %v2182_v12 }
 0x48c   : > { %3286 = vmatpush3.bf16.msra.mxu1 %v3629_v16  ;;  %3266 = vmatpush3.bf16.msra.mxu0 %v3632_v19 }
 0x48d   : > { %3287 = vmatprep.subr.bf16.mxu1 %v3631_v18  ;;  %3267 = vmatprep.subr.bf16.mxu0 %v3634_v20 }
 0x490   : > { %3288 = vmatpush3.bf16.msra.mxu1 %v3633_v37  ;;  %3268 = vmatpush3.bf16.msra.mxu0 %v3636_v22 }
 0x491   : > { %3289 = vmatprep.subr.bf16.mxu1 %v3635_v21  ;;  %3269 = vmatprep.subr.bf16.mxu0 %v3638_v24 }
 0x494   : > { %3290 = vmatpush3.bf16.msra.mxu1 %v3637_v23  ;;  %3270 = vmatpush3.bf16.msra.mxu0 %v3640_v26 }
 0x495   : > { %3291 = vmatprep.subr.bf16.mxu1 %v3639_v25  ;;  %3271 = vmatprep.subr.bf16.mxu0 %v3642_v28 }
 0x498   : > { %3292 = vmatpush3.bf16.msra.mxu1 %v3641_v27  ;;  %3272 = vmatpush3.bf16.msra.mxu0 %v3644_v30 }
 0x499   : > { %3293 = vmatprep.subr.bf16.mxu1 %v3643_v29  ;;  %3273 = vmatprep.subr.bf16.mxu0 %v3646_v32 }
 0x49c   : > { %3294 = vmatpush3.bf16.msra.mxu1 %v3645_v31  ;;  %3274 = vmatpush3.bf16.msra.mxu0 %v3648_v34 }
 0x49d   : > { %3295 = vmatprep.subr.bf16.mxu1 %v3647_v33  ;;  %3275 = vmatprep.subr.bf16.mxu0 %v3650_v36 }
 0x4a0   : > { %3296 = vmatpush3.bf16.msra.mxu1 %v3649_v35  ;;  %3276 = vmatpush3.bf16.msra.mxu0 %v3652_v39 }
 0x4a1   : > { %3297 = vmatprep.subr.bf16.mxu1 %v3651_v38  ;;  %3277 = vmatprep.subr.bf16.mxu0 %v3654_v42 }
 0x4a4   : > { %3298 = vmatpush3.bf16.msra.mxu1 %v3653_v41  ;;  %3278 = vmatpush3.bf16.msra.mxu0 %v3656_v47 }
 0x4a5   : > { %3299 = vmatprep.subr.bf16.mxu1 %v3655_v44 }
 0x4a8   : > { %3300 = vmatpush3.bf16.msra.mxu1 %v3657_v48 }
 0x552   : > { %v2228_v49 = vpop.f32.mrb[20].mxu0 }
 0x553   : > { %v3335_v50 = vpop.f32.mrb[21].mxu0 }
 0x554   : > { %v2231_v51 = vpop.f32.mrb[22].mxu0 }
 0x555   : > { %v3336_v52 = vpop.f32.mrb[23].mxu0 }
 0x556   : > { %v2274_v53 = vpop.f32.mrb[20].mxu1 }
 0x557   : > { %v3341_v54 = vpop.f32.mrb[21].mxu1 }
 0x558   : > { %v2277_v55 = vpop.f32.mrb[22].mxu1 }
 0x559   : > { %v3342_v56 = vpop.f32.mrb[23].mxu1 }
 0x55a   : > { %v2320_v58 = vpop.f32.mrb[24].mxu0 }
 0x55b   : > { %v2372_v59 = vcombine.low %v2228_v49, %v2320_v58  ;;  %v2373_v60 = vcombine.high %v2228_v49, %v2320_v58  ;;  %v3347_v61 = vpop.f32.mrb[25].mxu0 }
 0x55c   : > { %v2323_v62 = vpop.f32.mrb[26].mxu0 }
 0x55d   : > { %v3348_v63 = vpop.f32.mrb[27].mxu0  ;;  %v2380_v40 = vrot.slane %v2372_v59, %v4491_v57  ;;  %v2387_v6 = vrot.slane %v2373_v60, %v4491_v57 }
 0x55e   : > { %v2366_v1 = vpop.f32.mrb[24].mxu1 }
 0x55f   : > { %v2388_v2 = vcombine.low %v2274_v53, %v2366_v1  ;;  %v2389_v3 = vcombine.high %v2274_v53, %v2366_v1  ;;  %v3353_v4 = vpop.f32.mrb[25].mxu1 }
 0x560   : > { %v2369_v5 = vpop.f32.mrb[26].mxu1 }
 0x561   : > { %v2396_v43 = vrot.slane %v2388_v2, %v4491_v57  ;;  %v2403_v0 = vrot.slane %v2389_v3, %v4491_v57  ;;  %v3354_v7 = vpop.f32.mrb[27].mxu1 }
 0x563   : > { %v2404_v45 = vcombine.low %v2380_v40, %v2396_v43  ;;  %v2405_v8 = vcombine.high %v2380_v40, %v2396_v43  ;;  %v2420_v46 = vcombine.low %v2387_v6, %v2403_v0  ;;  %v2421_v9 = vcombine.high %v2387_v6, %v2403_v0 }
 0x565   : > { %v2412_v10 = vrot.slane %v2404_v45, %v4495_v11  ;;  %v2419_v12 = vrot.slane %v2405_v8, %v4495_v11  ;;  %v2428_v13 = vrot.slane %v2420_v46, %v4495_v11  ;;  %v2435_v14 = vrot.slane %v2421_v9, %v4495_v11 }
 0x567   : > { %v2440_v15 = vcombine.low %v2412_v10, %v2419_v12  ;;  %v3186_v16 = vcombine.high %v2412_v10, %v2419_v12  ;;  %v2456_v17 = vcombine.low %v2428_v13, %v2435_v14  ;;  %v3187_v18 = vcombine.high %v2428_v13, %v2435_v14 }
 0x569   : > { %v2447_v19 = vrot.slane %v2440_v15, %v4491_v57  ;;  %v2455_v37 = vrot.slane %v3186_v16, %v4491_v57  ;;  %v2463_v20 = vrot.slane %v2456_v17, %v4491_v57  ;;  %v2471_v21 = vrot.slane %v3187_v18, %v4491_v57 }
 0x56b   : > { %v2472_v22 = vcombine.low %v2447_v19, %v2455_v37  ;;  %v2488_v23 = vcombine.low %v2463_v20, %v2471_v21  ;;  %v2473_v24 = vcombine.high %v2447_v19, %v2455_v37  ;;  %v2489_v25 = vcombine.high %v2463_v20, %v2471_v21 }
 0x56d   : > { %v2480_v26 = vrot.slane %v2472_v22, %v4495_v11  ;;  %v2496_v27 = vrot.slane %v2488_v23, %v4495_v11  ;;  %v2487_v28 = vrot.slane %v2473_v24, %v4495_v11  ;;  %v2503_v29 = vrot.slane %v2489_v25, %v4495_v11  ;;  %v3188_v11 = vld [vmem:[%s4754_s21] ss:$0 sm:$0xff] }
 0x56f   : > { %v2505_v30 = vcombine.high %v2480_v26, %v2496_v27  ;;  %v2507_v31 = vcombine.high %v2487_v28, %v2503_v29  ;;  %v2504_v32 = vcombine.low %v2480_v26, %v2496_v27  ;;  %v2506_v33 = vcombine.low %v2487_v28, %v2503_v29 }
 0x571   : > { %v2509_v34 = vpack.c.bf16 %v2505_v30, %v2505_v30  ;;  %v2511_v35 = vpack.c.bf16 %v2507_v31, %v2507_v31  ;;  %v2508_v36 = vpack.c.bf16 %v2504_v32, %v2504_v32  ;;  %v2510_v57 = vpack.c.bf16 %v2506_v33, %v2506_v33 }
 0x573   : > { %2807 = vmatprep.mubr.bf16.mxu0 %v2509_v34  ;;  %2847 = vmatprep.mubr.bf16.mxu1 %v2511_v35 }
 0x574   : > { %2808 = vmatmul.mubr.bf16.vlgmr.msra.gmra.mrb[28].mxu0 %v2508_v36  ;;  %2848 = vmatmul.mubr.bf16.vlgmr.msra.gmra.mrb[28].mxu1 %v2510_v57 }
 0x647   : > { %v3279_v38 = vpop.f32.mrb[28].mxu0  ;;  %v3301_v39 = vpop.f32.mrb[28].mxu1 }
 0x648   : > { %v3280_v41 = vpop.f32.mrb[29].mxu0  ;;  %v3302_v42 = vpop.f32.mrb[29].mxu1 }
 0x649   : > { %v3281_v44 = vadd.f32 %v3280_v41, %v3279_v38  ;;  %v3303_v47 = vadd.f32 %v3302_v42, %v3301_v39  ;;  %v3282_v48 = vpop.f32.mrb[30].mxu0  ;;  %v3304_v49 = vpop.f32.mrb[30].mxu1 }
 0x64a   : > { %v3283_v50 = vpop.f32.mrb[31].mxu0  ;;  %v3305_v51 = vpop.f32.mrb[31].mxu1 }
 0x64b   : > { %v2810_v52 = vadd.f32 %v3281_v44, %v3188_v11 }
 0x64d   : > { %v2850_v53 = vadd.f32 %v3303_v47, %v2810_v52 }
 0x64f   : > { %2855 = vst [vmem:[%s614_s13] sm:$0xff] %v2850_v53 }
 0x650   : > { %3919 = shalt.err (!%p3916_p6)
}
 0x651   : > { %s3920_s24 = scalar_lea.hbm %s4621_s5, 128  ;;  %s3924_s18 = scalar_lea.hbm %s4756_s19, 256 }
 0x652   : > { %p3921_p2 = scmp.ne.s32.totalorder %s4621_s5, %s3920_s24  ;;  %p3925_p1 = scmp.lt.u32.totalorder %s4621_s5, %s4756_s19 }
 0x653   : > { %p3926_p4 = scmp.lt.u32.totalorder %s3924_s18, %s3920_s24  ;;  %p3928_p3 = scmp.lt.u32.totalorder %s3920_s24, %s4621_s5 }
 0x654   : > { %p3922_p11 = pnand %p3921_p2, %p4757_p0 }
 0x655   : > { %p3927_p13 = por %p3926_p4, %p3925_p1 }
 0x656   : > { %p3923_p8 = pneg %p3922_p11 }
 0x657   : > { %p3929_p12 = por %p3928_p3, %p3927_p13 }
 0x659   : > { %p3930_p9 = pnand %p3929_p12, %p3923_p8 }
 0x65b   : > { %3933 = shalt.err (!%p3930_p9)
}
 0x65c   : > { %3379 = dma.vmem_to_hbm [thread:$0]  (%p4757_p0), %s4623_s9, 128, %s4621_s5, %s2857_s29  }
 0x65d PF: > { %s4758_s27 = sld [smem:[#allocation26_spill]]  ;;  %s4759_s11 = sld [smem:[#allocation30_spill]] }
 0x65e   : > { %p4761_p7 = scmp.ge.s32.totalorder %s4008_s26, 2 }
 0x663   : > { %s2883_s7 = sand.u32 1, %s4758_s27   ;;  %p4760_p5 = scmp.ne.s32.totalorder %s4759_s11, 0 }
 0x664   : > { %s2884_s21 = scalar_lea.sflag [#allocation6], %s2883_s7 }
 0x665   : > { %p3408_p10 = pnand %p4761_p7, %p4760_p5 }
 0x667   : > { %3983 = dma.done.wait (!%p3408_p10), %s2884_s21, 128  }
 0x668   : > { %3985 = vsyncadd (!%p3408_p10), %s2884_s21, 4294967168  ;;  %s36_s26 = sadd.s32 1, %s4008_s26   ;;  %s4762_s30 = sld [smem:[#allocation27_spill]] }
 0x669   : > { %p33_p6 = scmp.ge.s32.totalorder %s36_s26, 4   ;;  %s4763_s23 = sld [smem:[#allocation33_spill]] }
 0x66a   : > { %s4764_s28 = sld [smem:[#allocation31_spill]]  ;;  %s4765_s21 = smov %s3992_s22 }
 0x66b   : > { %s4767_s24 = smov %s4004_s25  ;;  %35 = sbr.rel (!%p33_p6) target bundleno = 21 (0x15), region = 170 }
 0x66e   : > { %s4766_s22 = smov %s4762_s30 }
 0x670   : > { %s4768_s25 = smov %s4764_s28 }
 0x672   :  { %2889 = vsyncpa [#allocation5], 1 }
 0x673   :  { %2891 = vsyncpa [#allocation5 + $0x1], 1 }
 0x674   :  { %2892 = vsyncpa [#allocation8], 1 }
 0x675   :  { %2894 = vsyncpa [#allocation8 + $0x1], 1 }
 0x676   :  { %2895 = vsyncpa [#allocation11], 1 }
 0x677   :  { %2897 = vsyncpa [#allocation11 + $0x1], 1 }
 0x678   :  { %2898 = vsyncpa [#allocation14], 1 }
 0x679   :  { %2899 = vsyncpa [#allocation17], 1 }
 0x67a   :  { %2900 = vsyncpa [#allocation6], 1 }
 0x67b   :  { %2902 = vsyncpa [#allocation6 + $0x1], 1 }

</bundles_post_ra>
